<compile_context>
chip_gen: v6e
topology: v6e:2x2x1
jax: 0.10.0
libtpu: 0.0.40
codegen_flags: <defaults>
</compile_context>

<pallas_src>
import jax
import jax.numpy as jnp
from jax import lax
from jax.experimental import pallas as pl
from jax.experimental.pallas import tpu as pltpu

# Make the pure-JAX reference (and the in-kernel f32 dots) use true f32 matmul
# so the correctness checks are tight and backend-independent.
jax.config.update("jax_default_matmul_precision", "highest")

_LANE = 128


def _round_up(x, m):
    return (x + m - 1) // m * m


def _choose_batch_tiling(B, batch_tile):
    """Pick (B_pad, TB, num_tiles) with TB a multiple of 128 and minimal padding."""
    B_pad = _round_up(max(B, 1), _LANE)
    TB = min(_round_up(max(batch_tile, 1), _LANE), B_pad)
    num_tiles = pl.cdiv(B_pad, TB)
    # Re-balance TB so the last tile is not mostly padding (keep it 128-aligned).
    TB = _round_up(pl.cdiv(B_pad, num_tiles), _LANE)
    num_tiles = pl.cdiv(B_pad, TB)
    # Free 2-way split (no extra padding) so v7x's second TensorCore gets work.
    if num_tiles == 1 and TB >= 4 * _LANE and TB % (2 * _LANE) == 0:
        TB //= 2
        num_tiles = 2
    B_pad = num_tiles * TB
    return B_pad, TB, num_tiles


def _td3_q_kernel(obs_ref, act_ref, w1o_ref, w1a_ref, b1_ref,
                  w2_ref, b2_ref, w3_ref, b3_ref, o_ref):
    """One batch tile; weights/biases are VMEM-resident.

    Feature-major layout: h1/h2 are (H, TB), output is the lane-dense (1, TB).
    """
    contract_last = (((1,), (1,)), ((), ()))  # A @ B^T (contract both last dims)

    # Layer 1: split-weight dots replace concat([obs, act], -1) @ W1 and yield
    # the (H1, TB) feature-major result directly (no transpose, no concat).
    h1 = (lax.dot_general(w1o_ref[...], obs_ref[...], contract_last,
                          preferred_element_type=jnp.float32)
          + lax.dot_general(w1a_ref[...], act_ref[...], contract_last,
                            preferred_element_type=jnp.float32))
    h1 = jnp.maximum(h1 + b1_ref[...], 0.0)                     # (H1, TB)  f32

    # Layer 2: canonical matmul, N = TB so the MXU output is fully lane-dense.
    h2 = jnp.dot(w2_ref[...], h1.astype(w2_ref.dtype),
                 preferred_element_type=jnp.float32)
    h2 = jnp.maximum(h2 + b2_ref[...], 0.0)                     # (H2, TB)  f32

    # Output layer (out_features == 1): VPU multiply + sublane reduce (XLU)
    # instead of a 1-row MXU push; result is the lane-dense (1, TB) row.
    q = jnp.sum(h2 * w3_ref[...], axis=0, keepdims=True) + b3_ref[...]
    o_ref[...] = q.astype(o_ref.dtype)


def td3_q_forward(obs, act, params, *, batch_tile=1024, compute_dtype=jnp.float32):
    """TD3 Q(obs, act) -> (B, 1); the whole MLP runs inside one pallas_call.

    compute_dtype=jnp.bfloat16 halves obs/act HBM streaming and uses the native
    bf16 MXU path (v6e/v7x); accumulation and all elementwise math stay f32.
    """
    w1, b1, w2, b2, w3, b3 = params
    obs_dim = obs.shape[-1]
    act_dim = act.shape[-1]
    h1_dim = w1.shape[1]
    h2_dim = w2.shape[1]
    B = obs.shape[0]

    # Trace-time parameter reshaping (tiny, once per call): feature-major weights,
    # column biases.  Only the MXU operands are cast to compute_dtype.
    w1o_t = w1[:obs_dim].T.astype(compute_dtype)          # (H1, obs_dim)
    w1a_t = w1[obs_dim:].T.astype(compute_dtype)          # (H1, act_dim)
    w2_t = w2.T.astype(compute_dtype)                     # (H2, H1)
    b1_c = b1.reshape(h1_dim, 1).astype(jnp.float32)      # (H1, 1)
    b2_c = b2.reshape(h2_dim, 1).astype(jnp.float32)      # (H2, 1)
    w3_c = w3.reshape(h2_dim, 1).astype(jnp.float32)      # (H2, 1) -- stays on the VPU
    b3_c = b3.reshape(1, 1).astype(jnp.float32)           # (1, 1)

    obs = obs.astype(compute_dtype)
    act = act.astype(compute_dtype)

    B_pad, TB, num_tiles = _choose_batch_tiling(B, batch_tile)
    if B_pad != B:
        obs = jnp.pad(obs, ((0, B_pad - B), (0, 0)))
        act = jnp.pad(act, ((0, B_pad - B), (0, 0)))

    tiled = lambda d: pl.BlockSpec((TB, d), lambda i: (i, 0))        # batch-tiled inputs
    resident = lambda a: pl.BlockSpec(a.shape, lambda i: (0, 0))     # VMEM-resident params

    out = pl.pallas_call(
        _td3_q_kernel,
        out_shape=jax.ShapeDtypeStruct((1, B_pad), jnp.float32),     # lane-dense output
        grid=(num_tiles,),
        in_specs=[
            tiled(obs_dim),
            tiled(act_dim),
            resident(w1o_t),
            resident(w1a_t),
            resident(b1_c),
            resident(w2_t),
            resident(b2_c),
            resident(w3_c),
            resident(b3_c),
        ],
        out_specs=pl.BlockSpec((1, TB), lambda i: (0, i)),
        compiler_params=pltpu.CompilerParams(
            dimension_semantics=("parallel",)),
    )(obs, act, w1o_t, w1a_t, b1_c, w2_t, b2_c, w3_c, b3_c)

    return out[0, :B].reshape(B, 1)


def init_params(key, obs_dim, act_dim, hidden_sizes):
    """Deterministic init mimicking nn.Linear default (uniform +-1/sqrt(fan_in))."""
    sizes = [obs_dim + act_dim] + list(hidden_sizes) + [1]
    params = []
    for i in range(len(sizes) - 1):
        fan_in, fan_out = sizes[i], sizes[i + 1]
        key, kw, kb = jax.random.split(key, 3)
        bound = 1.0 / (fan_in ** 0.5)
        w = jax.random.uniform(kw, (fan_in, fan_out), jnp.float32, -bound, bound)
        b = jax.random.uniform(kb, (1, fan_out), jnp.float32, -bound, bound)
        params += [w, b]
    return tuple(params)


def reference_forward(obs, act, params):
    """Pure-JAX reference for correctness checks."""
    x = jnp.concatenate([obs, act], axis=-1)
    w1, b1, w2, b2, w3, b3 = params
    h = jnp.maximum(x @ w1 + b1, 0.0)
    h = jnp.maximum(h @ w2 + b2, 0.0)
    return h @ w3 + b3


if __name__ == "__main__":
    OBS_DIM, ACT_DIM = 24, 8
    HIDDEN = [32, 32]

    key = jax.random.PRNGKey(0)
    k_obs, k_act, k_params, k_obs2, k_act2 = jax.random.split(key, 5)
    params = init_params(k_params, OBS_DIM, ACT_DIM, HIDDEN)

    # Primary small-shape check (B=2, padded to one 128-lane tile).
    B = 2
    obs = jax.random.normal(k_obs, (B, OBS_DIM), jnp.float32)
    act = jax.random.normal(k_act, (B, ACT_DIM), jnp.float32)
    q = jax.block_until_ready(td3_q_forward(obs, act, params))
    q_ref = reference_forward(obs, act, params)
    assert q.shape == (B, 1), q.shape
    assert jnp.allclose(q, q_ref, atol=1e-4, rtol=1e-4), (q, q_ref)

    # Ragged batch exercising multiple grid tiles + tail padding (3 tiles of 768).
    B2 = 2055
    obs2 = jax.random.normal(k_obs2, (B2, OBS_DIM), jnp.float32)
    act2 = jax.random.normal(k_act2, (B2, ACT_DIM), jnp.float32)
    q2 = jax.block_until_ready(td3_q_forward(obs2, act2, params))
    q2_ref = reference_forward(obs2, act2, params)
    assert q2.shape == (B2, 1), q2.shape
    assert jnp.allclose(q2, q2_ref, atol=1e-4, rtol=1e-4)

    # bf16 streaming variant (HBM-traffic win on v6e/v7x); f32 accumulation.
    q3 = jax.block_until_ready(
        td3_q_forward(obs2, act2, params, compute_dtype=jnp.bfloat16))
    assert q3.shape == (B2, 1), q3.shape
    assert jnp.allclose(q3, q2_ref, atol=5e-2, rtol=5e-2)

    print("KERNEL_OK")
</pallas_src>

<mosaic_0001>
module attributes {stable_mosaic.version = 11 : i64} {
  func.func @_td3_q_kernel(%arg0: i32, %arg1: memref<128x24xf32, #tpu.memory_space<vmem>>, %arg2: memref<128x8xf32, #tpu.memory_space<vmem>>, %arg3: memref<32x24xf32, #tpu.memory_space<vmem>>, %arg4: memref<32x8xf32, #tpu.memory_space<vmem>>, %arg5: memref<32x1xf32, #tpu.memory_space<vmem>>, %arg6: memref<32x32xf32, #tpu.memory_space<vmem>>, %arg7: memref<32x1xf32, #tpu.memory_space<vmem>>, %arg8: memref<32x1xf32, #tpu.memory_space<vmem>>, %arg9: memref<1x1xf32, #tpu.memory_space<vmem>>, %arg10: memref<1x128xf32, #tpu.memory_space<vmem>>) attributes {dimension_semantics = [#tpu.dimension_semantics<parallel>], iteration_bounds = array<i64: 1>, scalar_prefetch = 0 : i64, scratch_operands = 0 : i64, tpu.core_type = #tpu.core_type<tc>, window_params = [{transform_indices = @transform_0, window_bounds = array<i64: 128, 24>}, {transform_indices = @transform_1, window_bounds = array<i64: 128, 8>}, {pipeline_mode = #tpu.pipeline_mode<synchronous>, transform_indices = @transform_2, window_bounds = array<i64: 32, 24>}, {pipeline_mode = #tpu.pipeline_mode<synchronous>, transform_indices = @transform_3, window_bounds = array<i64: 32, 8>}, {pipeline_mode = #tpu.pipeline_mode<synchronous>, transform_indices = @transform_4, window_bounds = array<i64: 32, 1>}, {pipeline_mode = #tpu.pipeline_mode<synchronous>, transform_indices = @transform_5, window_bounds = array<i64: 32, 32>}, {pipeline_mode = #tpu.pipeline_mode<synchronous>, transform_indices = @transform_6, window_bounds = array<i64: 32, 1>}, {pipeline_mode = #tpu.pipeline_mode<synchronous>, transform_indices = @transform_7, window_bounds = array<i64: 32, 1>}, {pipeline_mode = #tpu.pipeline_mode<synchronous>, transform_indices = @transform_8, window_bounds = array<i64: 1, 1>}, {transform_indices = @transform_9, window_bounds = array<i64: 1, 128>}]} {
    %c0 = arith.constant 0 : index
    %c0_0 = arith.constant 0 : index
    %0 = vector.load %arg3[%c0, %c0_0] : memref<32x24xf32, #tpu.memory_space<vmem>>, vector<32x24xf32>
    %c0_1 = arith.constant 0 : index
    %c0_2 = arith.constant 0 : index
    %1 = vector.load %arg1[%c0_1, %c0_2] : memref<128x24xf32, #tpu.memory_space<vmem>>, vector<128x24xf32>
    %cst = arith.constant dense<0.000000e+00> : vector<32x128xf32>
    %2 = tpu.matmul %0, %1, %cst {dimension_numbers = #tpu.dot_dimension_numbers<[1], [1], [0], [0], [0, 0, 1, 0], [], []>, precision = #tpu.contract_precision<fp32>} : vector<32x24xf32>, vector<128x24xf32>, vector<32x128xf32> -> vector<32x128xf32>
    %c0_3 = arith.constant 0 : index
    %c0_4 = arith.constant 0 : index
    %3 = vector.load %arg4[%c0_3, %c0_4] : memref<32x8xf32, #tpu.memory_space<vmem>>, vector<32x8xf32>
    %c0_5 = arith.constant 0 : index
    %c0_6 = arith.constant 0 : index
    %4 = vector.load %arg2[%c0_5, %c0_6] : memref<128x8xf32, #tpu.memory_space<vmem>>, vector<128x8xf32>
    %cst_7 = arith.constant dense<0.000000e+00> : vector<32x128xf32>
    %5 = tpu.matmul %3, %4, %cst_7 {dimension_numbers = #tpu.dot_dimension_numbers<[1], [1], [0], [0], [0, 0, 1, 0], [], []>, precision = #tpu.contract_precision<fp32>} : vector<32x8xf32>, vector<128x8xf32>, vector<32x128xf32> -> vector<32x128xf32>
    %6 = arith.addf %2, %5 : vector<32x128xf32>
    %c0_8 = arith.constant 0 : index
    %c0_9 = arith.constant 0 : index
    %7 = vector.load %arg5[%c0_8, %c0_9] : memref<32x1xf32, #tpu.memory_space<vmem>>, vector<32x1xf32>
    %8 = vector.broadcast %7 : vector<32x1xf32> to vector<32x128xf32>
    %9 = arith.addf %6, %8 : vector<32x128xf32>
    %cst_10 = arith.constant 0.000000e+00 : f32
    %10 = vector.broadcast %cst_10 : f32 to vector<32x128xf32>
    %11 = arith.maximumf %9, %10 : vector<32x128xf32>
    %c0_11 = arith.constant 0 : index
    %c0_12 = arith.constant 0 : index
    %12 = vector.load %arg6[%c0_11, %c0_12] : memref<32x32xf32, #tpu.memory_space<vmem>>, vector<32x32xf32>
    %cst_13 = arith.constant dense<0.000000e+00> : vector<32x128xf32>
    %13 = tpu.matmul %12, %11, %cst_13 {dimension_numbers = #tpu.dot_dimension_numbers<[1], [0], [0], [1], [0, 0, 1, 1], [], []>, precision = #tpu.contract_precision<fp32>} : vector<32x32xf32>, vector<32x128xf32>, vector<32x128xf32> -> vector<32x128xf32>
    %c0_14 = arith.constant 0 : index
    %c0_15 = arith.constant 0 : index
    %14 = vector.load %arg7[%c0_14, %c0_15] : memref<32x1xf32, #tpu.memory_space<vmem>>, vector<32x1xf32>
    %15 = vector.broadcast %14 : vector<32x1xf32> to vector<32x128xf32>
    %16 = arith.addf %13, %15 : vector<32x128xf32>
    %cst_16 = arith.constant 0.000000e+00 : f32
    %17 = vector.broadcast %cst_16 : f32 to vector<32x128xf32>
    %18 = arith.maximumf %16, %17 : vector<32x128xf32>
    %c0_17 = arith.constant 0 : index
    %c0_18 = arith.constant 0 : index
    %19 = vector.load %arg8[%c0_17, %c0_18] : memref<32x1xf32, #tpu.memory_space<vmem>>, vector<32x1xf32>
    %20 = vector.broadcast %19 : vector<32x1xf32> to vector<32x128xf32>
    %21 = arith.mulf %18, %20 : vector<32x128xf32>
    %cst_19 = arith.constant dense<0.000000e+00> : vector<128xf32>
    %22 = vector.multi_reduction <add>, %21, %cst_19 [0] : vector<32x128xf32> to vector<128xf32>
    %23 = vector.shape_cast %22 : vector<128xf32> to vector<1x128xf32>
    %c0_20 = arith.constant 0 : index
    %c0_21 = arith.constant 0 : index
    %24 = vector.load %arg9[%c0_20, %c0_21] : memref<1x1xf32, #tpu.memory_space<vmem>>, vector<1x1xf32>
    %25 = vector.broadcast %24 : vector<1x1xf32> to vector<1x128xf32>
    %26 = arith.addf %23, %25 : vector<1x128xf32>
    %c0_22 = arith.constant 0 : index
    %c0_23 = arith.constant 0 : index
    %27 = vector.load %arg10[%c0_22, %c0_23] : memref<1x128xf32, #tpu.memory_space<vmem>>, vector<1x128xf32>
    tpu.vector_store %arg10[%c0_22, %c0_23], %26 {strides = array<i32>} : memref<1x128xf32, #tpu.memory_space<vmem>>, vector<1x128xf32>,
    return
  }
  func.func @transform_0(%arg0: i32) -> (i32, i32) {
    %c0_i32 = arith.constant 0 : i32
    %c0_i32_0 = arith.constant 0 : i32
    return %arg0, %c0_i32 : i32, i32
  }
  func.func @transform_1(%arg0: i32) -> (i32, i32) {
    %c0_i32 = arith.constant 0 : i32
    %c0_i32_0 = arith.constant 0 : i32
    return %arg0, %c0_i32 : i32, i32
  }
  func.func @transform_2(%arg0: i32) -> (i32, i32) {
    %c0_i32 = arith.constant 0 : i32
    %c0_i32_0 = arith.constant 0 : i32
    %c0_i32_1 = arith.constant 0 : i32
    return %c0_i32, %c0_i32_0 : i32, i32
  }
  func.func @transform_3(%arg0: i32) -> (i32, i32) {
    %c0_i32 = arith.constant 0 : i32
    %c0_i32_0 = arith.constant 0 : i32
    %c0_i32_1 = arith.constant 0 : i32
    return %c0_i32, %c0_i32_0 : i32, i32
  }
  func.func @transform_4(%arg0: i32) -> (i32, i32) {
    %c0_i32 = arith.constant 0 : i32
    %c0_i32_0 = arith.constant 0 : i32
    %c0_i32_1 = arith.constant 0 : i32
    return %c0_i32, %c0_i32_0 : i32, i32
  }
  func.func @transform_5(%arg0: i32) -> (i32, i32) {
    %c0_i32 = arith.constant 0 : i32
    %c0_i32_0 = arith.constant 0 : i32
    %c0_i32_1 = arith.constant 0 : i32
    return %c0_i32, %c0_i32_0 : i32, i32
  }
  func.func @transform_6(%arg0: i32) -> (i32, i32) {
    %c0_i32 = arith.constant 0 : i32
    %c0_i32_0 = arith.constant 0 : i32
    %c0_i32_1 = arith.constant 0 : i32
    return %c0_i32, %c0_i32_0 : i32, i32
  }
  func.func @transform_7(%arg0: i32) -> (i32, i32) {
    %c0_i32 = arith.constant 0 : i32
    %c0_i32_0 = arith.constant 0 : i32
    %c0_i32_1 = arith.constant 0 : i32
    return %c0_i32, %c0_i32_0 : i32, i32
  }
  func.func @transform_8(%arg0: i32) -> (i32, i32) {
    %c0_i32 = arith.constant 0 : i32
    %c0_i32_0 = arith.constant 0 : i32
    %c0_i32_1 = arith.constant 0 : i32
    return %c0_i32, %c0_i32_0 : i32, i32
  }
  func.func @transform_9(%arg0: i32) -> (i32, i32) {
    %c0_i32 = arith.constant 0 : i32
    %c0_i32_0 = arith.constant 0 : i32
    return %c0_i32, %arg0 : i32, i32
  }
}

</mosaic_0001>

<bundles_post_ra>
// kernel: tpu_custom_call.1
= control target key start
LH: loop header
LB: loop body
LE: loop exit
PB: predicated region body
PF: predicated region fallthrough
CT: control target
= control target key end

     0   :  { %s4471_s0 = inlined_call_operand.vmem [shape: f32[128,24], index: 0, kind: input, shape index: {}]   ;;  %s4472_s1 = inlined_call_operand.vmem [shape: f32[128,8], index: 1, kind: input, shape index: {}]   ;;  %s4473_s2 = inlined_call_operand.vmem [shape: f32[32,24], index: 2, kind: input, shape index: {}]   ;;  %s4474_s3 = inlined_call_operand.vmem [shape: f32[32,8], index: 3, kind: input, shape index: {}]   ;;  %s4475_s4 = inlined_call_operand.vmem [shape: f32[32,1], index: 4, kind: input, shape index: {}]   ;;  %s4476_s5 = inlined_call_operand.vmem [shape: f32[32,32], index: 5, kind: input, shape index: {}]   ;;  %s4477_s6 = inlined_call_operand.vmem [shape: f32[32,1], index: 6, kind: input, shape index: {}]   ;;  %s4478_s7 = inlined_call_operand.vmem [shape: f32[32,1], index: 7, kind: input, shape index: {}]   ;;  %s4479_s8 = inlined_call_operand.<no memory space> [shape: f32[1,1], index: 8, kind: input, shape index: {}]   ;;  %s4480_s9 = inlined_call_operand.hbm [shape: f32[1,128], index: 9, kind: output, shape index: {}]  }
   0x1   :  { %v14_v0 = vstv %s4479_s8 }
   0x2   :  { %15 = vst [vmem:[#allocation2] sm:$0x1] %v14_v0 }
   0x3   :  { %v74_v1 = vld [vmem:[%s4472_s1 + $0x78] sm:$0xff]  ;;  %vm75_vm0 = vcmask 64512   ;;  %v73_v2 = vld [vmem:[%s4472_s1 + $0x70] sm:$0xff]  ;;  %v72_v3 = vld [vmem:[%s4472_s1 + $0x68] sm:$0xff] }
   0x4   :  { %v134_v4 = vsel %vm75_vm0, %v74_v1, 0  ;;  %v131_v5 = vsel %vm75_vm0, %v73_v2, 0  ;;  %v128_v6 = vsel %vm75_vm0, %v72_v3, 0  ;;  %v71_v7 = vld [vmem:[%s4472_s1 + $0x60] sm:$0xff]  ;;  %v70_v8 = vld [vmem:[%s4472_s1 + $0x58] sm:$0xff]  ;;  %v69_v13 = vld [vmem:[%s4472_s1 + $0x50] sm:$0xff] }
   0x5   :  { %v3418_v9 = vand.u32 4294901760, %v134_v4  ;;  %v3420_v10 = vand.u32 4294901760, %v131_v5  ;;  %v3422_v11 = vand.u32 4294901760, %v128_v6  ;;  %v125_v12 = vsel %vm75_vm0, %v71_v7, 0  ;;  %v68_v25 = vld [vmem:[%s4472_s1 + $0x48] sm:$0xff] }
   0x6   :  { %v3428_v14 = vand.u32 4294901760, %v125_v12  ;;  %v122_v15 = vsel %vm75_vm0, %v70_v8, 0  ;;  %v119_v20 = vsel %vm75_vm0, %v69_v13, 0 }
   0x7   :  { %2779 = vmatprep.subr.mxu0 %v3418_v9  ;;  %v3433_v16 = vsub.f32 %v134_v4, %v3418_v9  ;;  %v3436_v17 = vsub.f32 %v131_v5, %v3420_v10  ;;  %v3439_v18 = vsub.f32 %v128_v6, %v3422_v11  ;;  %v3442_v19 = vand.u32 4294901760, %v122_v15 }
   0x8   :  { %2780 = vmatpush3.xpose.msra.mxu0 %v3418_v9  ;;  %v3456_v24 = vsub.f32 %v125_v12, %v3428_v14 }
   0x9   :  { %2781 = vmatprep.subr.mxu0 %v3420_v10  ;;  %v3447_v21 = vand.u32 4294901760, %v3433_v16  ;;  %v3450_v22 = vand.u32 4294901760, %v3436_v17  ;;  %v3453_v23 = vand.u32 4294901760, %v3439_v18 }
   0xa   :  { %16 = vsyncpa [#allocation4], 0  ;;  %v3466_v28 = vand.u32 4294901760, %v119_v20  ;;  %v116_v29 = vsel %vm75_vm0, %v68_v25, 0  ;;  %v3470_v30 = vsub.f32 %v122_v15, %v3442_v19  ;;  %v3476_v34 = vand.u32 4294901760, %v3456_v24  ;;  %v67_v35 = vld [vmem:[%s4472_s1 + $0x40] sm:$0xff] }
   0xb   :  { %v261_v26 = vsub.f32 %v3433_v16, %v3447_v21  ;;  %v268_v27 = vsub.f32 %v3436_v17, %v3450_v22  ;;  %v275_v33 = vsub.f32 %v3439_v18, %v3453_v23  ;;  %v3482_v36 = vand.u32 4294901760, %v116_v29  ;;  %v66_v42 = vld [vmem:[%s4472_s1 + $0x38] sm:$0xff]  ;;  %v55_v49 = vld [vmem:[%s4474_s3] sm:$0xff]  ;;  %v65_v50 = vld [vmem:[%s4472_s1 + $0x30] sm:$0xff] }
   0xc   :  { %2782 = vmatpush3.xpose.msra.mxu0 %v3420_v10  ;;  %v3485_v37 = vsub.f32 %v119_v20, %v3466_v28  ;;  %v282_v39 = vsub.f32 %v3456_v24, %v3476_v34  ;;  %v3491_v40 = vand.u32 4294901760, %v3470_v30  ;;  %v113_v41 = vsel %vm75_vm0, %v67_v35, 0  ;;  %v64_v58 = vld [vmem:[%s4472_s1 + $0x28] sm:$0xff]  ;;  %v63_v3 = vld [vmem:[%s4472_s1 + $0x20] sm:$0xff]  ;;  %v62_v20 = vld [vmem:[%s4472_s1 + $0x18] sm:$0xff] }
   0xd   :  { %2783 = vmatprep.subr.mxu0 %v3422_v11  ;;  %v262_v31 = vand.u32 4294901760, %v261_v26  ;;  %v269_v32 = vand.u32 4294901760, %v268_v27  ;;  %v276_v38 = vand.u32 4294901760, %v275_v33  ;;  %v3502_v44 = vsub.f32 %v116_v29, %v3482_v36  ;;  %v61_v35 = vld [vmem:[%s4472_s1 + $0x10] sm:$0xff] }
   0xe   :  { %v3499_v43 = vand.u32 4294901760, %v3485_v37  ;;  %v283_v45 = vand.u32 4294901760, %v282_v39  ;;  %v289_v46 = vsub.f32 %v3470_v30, %v3491_v40  ;;  %v3507_v47 = vand.u32 4294901760, %v113_v41 }
   0xf   :  { %2817 = vmatprep.subr.mxu1 %v262_v31  ;;  %v110_v48 = vsel %vm75_vm0, %v66_v42, 0  ;;  %v3522_v53 = vand.u32 4294901760, %v3502_v44  ;;  %v77_v54 = vsel %vm75_vm0, %v55_v49, 0  ;;  %v107_v56 = vsel %vm75_vm0, %v65_v50, 0 }
  0x10   :  { %2784 = vmatpush3.xpose.msra.mxu0 %v3422_v11  ;;  %2818 = vmatpush3.xpose.msra.mxu1 %v262_v31  ;;  %v296_v51 = vsub.f32 %v3485_v37, %v3499_v43  ;;  %v3519_v52 = vand.u32 4294901760, %v110_v48  ;;  %v290_v55 = vand.u32 4294901760, %v289_v46  ;;  %v3528_v57 = vsub.f32 %v113_v41, %v3507_v47 }
  0x11   :  { %2785 = vmatprep.subr.mxu0 %v3428_v14  ;;  %2819 = vmatprep.subr.mxu1 %v269_v32  ;;  %v3533_v59 = vand.u32 4294901760, %v77_v54  ;;  %v3540_v62 = vand.u32 4294901760, %v107_v56  ;;  %v104_v63 = vsel %vm75_vm0, %v64_v58, 0  ;;  %v303_v0 = vsub.f32 %v3502_v44, %v3522_v53  ;;  %v59_v58 = vld [vmem:[%s4472_s1] sm:$0xff] }
  0x12   :  { %v297_v61 = vand.u32 4294901760, %v296_v51  ;;  %v3547_v1 = vand.u32 4294901760, %v3528_v57  ;;  %v3550_v2 = vsub.f32 %v110_v48, %v3519_v52  ;;  %v3560_v6 = vand.u32 4294901760, %v104_v63  ;;  %v60_v48 = vld [vmem:[%s4472_s1 + $0x8] sm:$0xff] }
  0x13   :  { %v3536_v60 = vsub.f32 %v77_v54, %v3533_v59  ;;  %2849 = vmatprep.mubr.f32.mxu1 %v3533_v59  ;;  %v101_v7 = vsel %vm75_vm0, %v63_v3, 0  ;;  %v3564_v8 = vsub.f32 %v107_v56, %v3540_v62  ;;  %v304_v12 = vand.u32 4294901760, %v303_v0 }
  0x14   :  { %2786 = vmatpush3.xpose.msra.mxu0 %v3428_v14  ;;  %2820 = vmatpush3.xpose.msra.mxu1 %v269_v32  ;;  %v310_v13 = vsub.f32 %v3528_v57, %v3547_v1  ;;  %v3570_v15 = vand.u32 4294901760, %v3550_v2  ;;  %v3576_v26 = vand.u32 4294901760, %v101_v7  ;;  %v98_v27 = vsel %vm75_vm0, %v62_v20, 0 }
  0x15   :  { %2787 = vmatprep.subr.mxu0 %v3442_v19  ;;  %2821 = vmatprep.subr.mxu1 %v276_v38  ;;  %v4481_v4 = vand.u32 4294901760, %v3536_v60  ;;  %v3583_v32 = vand.u32 4294901760, %v3564_v8  ;;  %v3586_v33 = vsub.f32 %v104_v63, %v3560_v6  ;;  %v95_v39 = vsel %vm75_vm0, %v61_v35, 0 }
  0x16   :  { %v311_v29 = vand.u32 4294901760, %v310_v13  ;;  %v317_v31 = vsub.f32 %v3550_v2, %v3570_v15  ;;  %v3602_v46 = vsub.f32 %v101_v7, %v3576_v26  ;;  %v3608_v49 = vand.u32 4294901760, %v95_v39 }
  0x17   :  { %v220_v5 = vsub.f32 %v3536_v60, %v4481_v4  ;;  %v324_v42 = vsub.f32 %v3564_v8, %v3583_v32  ;;  %v92_v50 = vsel %vm75_vm0, %v60_v48, 0  ;;  %v89_v0 = vsel %vm75_vm0, %v59_v58, 0 }
  0x18   :  { %2788 = vmatpush3.xpose.msra.mxu0 %v3442_v19  ;;  %2822 = vmatpush3.xpose.msra.mxu1 %v276_v38  ;;  %v3592_v38 = vand.u32 4294901760, %v98_v27  ;;  %v318_v41 = vand.u32 4294901760, %v317_v31  ;;  %v3627_v63 = vand.u32 4294901760, %v92_v50  ;;  %v3641_v20 = vsub.f32 %v95_v39, %v3608_v49 }
  0x19   :  { %2789 = vmatprep.subr.mxu0 %v3466_v28  ;;  %2823 = vmatprep.subr.mxu1 %v283_v45  ;;  %v221_v25 = vand.u32 4294901760, %v220_v5  ;;  %v325_v51 = vand.u32 4294901760, %v324_v42  ;;  %v57_v5 = vld [vmem:[%s4474_s3 + $0x10] sm:$0xff]  ;;  %v3650_v31 = vand.u32 4294901760, %v89_v0  ;;  %vm906_vm1 = vcmask 195584  }
  0x1a   :  { %v3618_v56 = vsub.f32 %v98_v27, %v3592_v38  ;;  %v3657_v42 = vand.u32 4294901760, %v3641_v20  ;;  %v3660_v48 = vsub.f32 %v92_v50, %v3627_v63  ;;  %vm1797_vm2 = vcmask 261120  }
  0x1b   :  { %2811 = vmatprep.mubr.f32.mxu0 %v221_v25  ;;  %v58_v25 = vld [vmem:[%s4474_s3 + $0x18] sm:$0xff] }
  0x1c   :  { %2790 = vmatpush3.xpose.msra.mxu0 %v3466_v28  ;;  %2824 = vmatpush3.xpose.msra.mxu1 %v283_v45  ;;  %v3599_v45 = vand.u32 4294901760, %v3586_v33  ;;  %v3638_v13 = vand.u32 4294901760, %v3618_v56  ;;  %v86_v35 = vsel %vm75_vm0, %v58_v25, 0  ;;  %4503 = vst [vmem:[#allocation8_spill] sm:$0xff] %v3657_v42  ;;  %v3674_v50 = vand.u32 4294901760, %v3660_v48 }
  0x1d   :  { %2791 = vmatprep.subr.mxu0 %v3482_v36  ;;  %2825 = vmatprep.subr.mxu1 %v290_v55  ;;  %v3667_v58 = vand.u32 4294901760, %v86_v35 }
  0x1e   :  { %v331_v54 = vsub.f32 %v3586_v33, %v3599_v45  ;;  %4502 = vst [vmem:[#allocation7_spill] sm:$0xff] %v3638_v13  ;;  %4504 = vst [vmem:[#allocation9_spill] sm:$0xff] %v3674_v50  ;;  %v359_v4 = vsub.f32 %v3660_v48, %v3674_v50 }
  0x20   :  { %2792 = vmatpush3.xpose.msra.mxu0 %v3482_v36  ;;  %2826 = vmatpush3.xpose.msra.mxu1 %v290_v55  ;;  %v3615_v55 = vand.u32 4294901760, %v3602_v46  ;;  %v332_v7 = vand.u32 4294901760, %v331_v54 }
  0x21   :  { %2793 = vmatprep.subr.mxu0 %v3507_v47  ;;  %2827 = vmatprep.subr.mxu1 %v297_v61 }
  0x22   :  { %4501 = vst [vmem:[#allocation6_spill] sm:$0xff] %v3615_v55 }
  0x24   :  { %2794 = vmatpush3.xpose.msra.mxu0 %v3507_v47  ;;  %2828 = vmatpush3.xpose.msra.mxu1 %v297_v61  ;;  %v56_v61 = vld [vmem:[%s4474_s3 + $0x8] sm:$0xff] }
  0x25   :  { %2795 = vmatprep.subr.mxu0 %v3519_v52  ;;  %2829 = vmatprep.subr.mxu1 %v304_v12  ;;  %v80_v3 = vsel %vm75_vm0, %v56_v61, 0 }
  0x26   :  { %v3646_v27 = vand.u32 4294901760, %v80_v3 }
  0x28   :  { %2796 = vmatpush3.xpose.msra.mxu0 %v3519_v52  ;;  %2830 = vmatpush3.xpose.msra.mxu1 %v304_v12  ;;  %v338_v12 = vsub.f32 %v3602_v46, %v3615_v55 }
  0x29   :  { %2797 = vmatprep.subr.mxu0 %v3540_v62  ;;  %2831 = vmatprep.subr.mxu1 %v311_v29 }
  0x2a   :  { %v339_v39 = vand.u32 4294901760, %v338_v12  ;;  %v3677_v12 = vsub.f32 %v89_v0, %v3650_v31 }
  0x2c   :  { %2798 = vmatpush3.xpose.msra.mxu0 %v3540_v62  ;;  %2832 = vmatpush3.xpose.msra.mxu1 %v311_v29  ;;  %v83_v29 = vsel %vm75_vm0, %v57_v5, 0  ;;  %v352_v5 = vsub.f32 %v3641_v20, %v3657_v42  ;;  %v3691_v0 = vand.u32 4294901760, %v3677_v12 }
  0x2d   :  { %2799 = vmatprep.subr.mxu0 %v3560_v6  ;;  %2833 = vmatprep.subr.mxu1 %v318_v41  ;;  %v3662_v54 = vand.u32 4294901760, %v83_v29 }
  0x30   :  { %2800 = vmatpush3.xpose.msra.mxu0 %v3560_v6  ;;  %2834 = vmatpush3.xpose.msra.mxu1 %v318_v41  ;;  %v345_v41 = vsub.f32 %v3618_v56, %v3638_v13 }
  0x31   :  { %2801 = vmatprep.subr.mxu0 %v3576_v26  ;;  %2835 = vmatprep.subr.mxu1 %v325_v51 }
  0x32   :  { %v346_v61 = vand.u32 4294901760, %v345_v41  ;;  %v353_v41 = vand.u32 4294901760, %v352_v5  ;;  %v366_v5 = vsub.f32 %v3677_v12, %v3691_v0 }
  0x34   :  { %2802 = vmatpush3.xpose.msra.mxu0 %v3576_v26  ;;  %2836 = vmatpush3.xpose.msra.mxu1 %v325_v51  ;;  %v3665_v51 = vsub.f32 %v80_v3, %v3646_v27  ;;  %v3680_v3 = vsub.f32 %v83_v29, %v3662_v54 }
  0x35   :  { %2803 = vmatprep.subr.mxu0 %v3592_v38  ;;  %2837 = vmatprep.subr.mxu1 %v332_v7 }
  0x36   :  { %v4488_v25 = vand.u32 4294901760, %v3665_v51  ;;  %v239_v29 = vand.u32 4294901760, %v3680_v3 }
  0x38   :  { %2804 = vmatpush3.xpose.msra.mxu0 %v3592_v38  ;;  %2838 = vmatpush3.xpose.msra.mxu1 %v332_v7  ;;  %v3684_v7 = vsub.f32 %v86_v35, %v3667_v58  ;;  %v230_v35 = vsub.f32 %v3665_v51, %v4488_v25  ;;  %v240_v50 = vsub.f32 %v3680_v3, %v239_v29 }
  0x39   :  { %2805 = vmatprep.subr.mxu0 %v3608_v49  ;;  %2839 = vmatprep.subr.mxu1 %v339_v39 }
  0x3a   :  { %v249_v42 = vand.u32 4294901760, %v3684_v7  ;;  %v231_v13 = vand.u32 4294901760, %v230_v35 }
  0x3c   :  { %2806 = vmatpush3.xpose.msra.mxu0 %v3608_v49  ;;  %2840 = vmatpush3.xpose.msra.mxu1 %v339_v39  ;;  %v360_v39 = vand.u32 4294901760, %v359_v4  ;;  %v250_v25 = vsub.f32 %v3684_v7, %v249_v42  ;;  %v241_v4 = vand.u32 4294901760, %v240_v50 }
  0x3d   :  { %2807 = vmatprep.subr.mxu0 %v3627_v63  ;;  %2841 = vmatprep.subr.mxu1 %v346_v61 }
  0x3e   :  { %v251_v55 = vand.u32 4294901760, %v250_v25 }
  0x40   :  { %2808 = vmatpush3.xpose.msra.mxu0 %v3627_v63  ;;  %2842 = vmatpush3.xpose.msra.mxu1 %v346_v61  ;;  %v367_v61 = vand.u32 4294901760, %v366_v5  ;;  %v45_v5 = vld [vmem:[%s4471_s0 + $0x30] sm:$0xff] }
  0x41   :  { %2809 = vmatprep.subr.mxu0 %v3650_v31  ;;  %2843 = vmatprep.subr.mxu1 %v353_v41 }
  0x44   :  { %2810 = vmatpush3.xpose.msra.mxu0 %v3650_v31  ;;  %2844 = vmatpush3.xpose.msra.mxu1 %v353_v41 }
  0x45   :  { %2845 = vmatprep.subr.mxu1 %v360_v39  ;;  %2855 = vmatprep.subr.mxu0 %v3433_v16 }
  0x47   :  { %2812 = vmatmul.mubr.f32.vlgmr.msra.gmra.mxu0 %v231_v13 }
  0x48   :  { %2846 = vmatpush3.xpose.msra.mxu1 %v360_v39  ;;  %2856 = vmatpush3.xpose.msra.mxu0 %v3433_v16  ;;  %v4505_v16 = vand.u32 4294901760, %v3536_v60 }
  0x49   :  { %2847 = vmatprep.subr.mxu1 %v367_v61  ;;  %2857 = vmatprep.subr.mxu0 %v3436_v17 }
  0x4a   :  { %2814 = vmatprep.mubr.f32.mxu0 %v241_v4 }
  0x4b   :  { %2815 = vmatmul.mubr.f32.gmra.mxu0 %v251_v55  ;;  %v48_v55 = vld [vmem:[%s4471_s0 + $0x48] sm:$0xff] }
  0x4c   :  { %2848 = vmatpush3.xpose.msra.mxu1 %v367_v61  ;;  %2858 = vmatpush3.xpose.msra.mxu0 %v3436_v17  ;;  %v4506_v17 = vand.u32 4294901760, %v3665_v51 }
  0x4d   :  { %2859 = vmatprep.subr.mxu0 %v3439_v18  ;;  %2893 = vmatprep.subr.mxu1 %v3418_v9 }
  0x4e   :  { %2887 = vmatprep.mubr.f32.mxu0 %v3536_v60  ;;  %v50_v60 = vld [vmem:[%s4471_s0 + $0x58] sm:$0xff] }
  0x4f   :  { %2850 = vmatmul.mubr.f32.vlgmr.msra.gmra.mxu1 %v3646_v27 }
  0x50   :  { %2860 = vmatpush3.xpose.msra.mxu0 %v3439_v18  ;;  %2894 = vmatpush3.xpose.msra.mxu1 %v3418_v9 }
  0x51   :  { %2861 = vmatprep.subr.mxu0 %v3456_v24  ;;  %2895 = vmatprep.subr.mxu1 %v3420_v10 }
  0x52   :  { %2852 = vmatprep.mubr.f32.mxu1 %v3662_v54 }
  0x53   :  { %2853 = vmatmul.mubr.f32.gmra.mxu1 %v3667_v58 }
  0x54   :  { %2862 = vmatpush3.xpose.msra.mxu0 %v3456_v24  ;;  %2896 = vmatpush3.xpose.msra.mxu1 %v3420_v10  ;;  %v52_v24 = vld [vmem:[%s4471_s0 + $0x68] sm:$0xff] }
  0x55   :  { %2863 = vmatprep.subr.mxu0 %v3470_v30  ;;  %2897 = vmatprep.subr.mxu1 %v3422_v11 }
  0x56   :  { %2925 = vmatprep.mubr.f32.mxu1 %v4505_v16 }
  0x58   :  { %2864 = vmatpush3.xpose.msra.mxu0 %v3470_v30  ;;  %2898 = vmatpush3.xpose.msra.mxu1 %v3422_v11 }
  0x59   :  { %2865 = vmatprep.subr.mxu0 %v3485_v37  ;;  %2899 = vmatprep.subr.mxu1 %v3428_v14 }
  0x5c   :  { %2866 = vmatpush3.xpose.msra.mxu0 %v3485_v37  ;;  %2900 = vmatpush3.xpose.msra.mxu1 %v3428_v14 }
  0x5d   :  { %2867 = vmatprep.subr.mxu0 %v3502_v44  ;;  %2901 = vmatprep.subr.mxu1 %v3442_v19 }
  0x60   :  { %2868 = vmatpush3.xpose.msra.mxu0 %v3502_v44  ;;  %2902 = vmatpush3.xpose.msra.mxu1 %v3442_v19  ;;  %v51_v44 = vld [vmem:[%s4471_s0 + $0x60] sm:$0xff] }
  0x61   :  { %2869 = vmatprep.subr.mxu0 %v3528_v57  ;;  %2903 = vmatprep.subr.mxu1 %v3466_v28 }
  0x64   :  { %2870 = vmatpush3.xpose.msra.mxu0 %v3528_v57  ;;  %2904 = vmatpush3.xpose.msra.mxu1 %v3466_v28 }
  0x65   :  { %2871 = vmatprep.subr.mxu0 %v3550_v2  ;;  %2905 = vmatprep.subr.mxu1 %v3482_v36 }
  0x68   :  { %2872 = vmatpush3.xpose.msra.mxu0 %v3550_v2  ;;  %2906 = vmatpush3.xpose.msra.mxu1 %v3482_v36 }
  0x69   :  { %2873 = vmatprep.subr.mxu0 %v3564_v8  ;;  %2907 = vmatprep.subr.mxu1 %v3507_v47 }
  0x6c   :  { %2874 = vmatpush3.xpose.msra.mxu0 %v3564_v8  ;;  %2908 = vmatpush3.xpose.msra.mxu1 %v3507_v47  ;;  %v953_v8 = vsel %vm906_vm1, %v50_v60, 0 }
  0x6d   :  { %2875 = vmatprep.subr.mxu0 %v3586_v33  ;;  %2909 = vmatprep.subr.mxu1 %v3519_v52 }
  0x70   :  { %2876 = vmatpush3.xpose.msra.mxu0 %v3586_v33  ;;  %2910 = vmatpush3.xpose.msra.mxu1 %v3519_v52 }
  0x71   :  { %2877 = vmatprep.subr.mxu0 %v3602_v46  ;;  %2911 = vmatprep.subr.mxu1 %v3540_v62 }
  0x74   :  { %2878 = vmatpush3.xpose.msra.mxu0 %v3602_v46  ;;  %2912 = vmatpush3.xpose.msra.mxu1 %v3540_v62 }
  0x75   :  { %2879 = vmatprep.subr.mxu0 %v3618_v56  ;;  %2913 = vmatprep.subr.mxu1 %v3560_v6 }
  0x78   :  { %2880 = vmatpush3.xpose.msra.mxu0 %v3618_v56  ;;  %2914 = vmatpush3.xpose.msra.mxu1 %v3560_v6 }
  0x79   :  { %2881 = vmatprep.subr.mxu0 %v3641_v20  ;;  %2915 = vmatprep.subr.mxu1 %v3576_v26 }
  0x7c   :  { %2882 = vmatpush3.xpose.msra.mxu0 %v3641_v20  ;;  %2916 = vmatpush3.xpose.msra.mxu1 %v3576_v26 }
  0x7d   :  { %2883 = vmatprep.subr.mxu0 %v3660_v48  ;;  %2917 = vmatprep.subr.mxu1 %v3592_v38 }
  0x80   :  { %2884 = vmatpush3.xpose.msra.mxu0 %v3660_v48  ;;  %2918 = vmatpush3.xpose.msra.mxu1 %v3592_v38 }
  0x81   :  { %2885 = vmatprep.subr.mxu0 %v3677_v12  ;;  %2919 = vmatprep.subr.mxu1 %v3608_v49 }
  0x84   :  { %2886 = vmatpush3.xpose.msra.mxu0 %v3677_v12  ;;  %2920 = vmatpush3.xpose.msra.mxu1 %v3608_v49 }
  0x85   :  { %2921 = vmatprep.subr.mxu1 %v3627_v63  ;;  %2931 = vmatprep.subr.mxu0 %v3447_v21 }
  0x87   :  { %2888 = vmatmul.mubr.f32.vlgmr.msra.gmra.mxu0 %v3665_v51 }
  0x88   :  { %2922 = vmatpush3.xpose.msra.mxu1 %v3627_v63  ;;  %2932 = vmatpush3.xpose.msra.mxu0 %v3447_v21  ;;  %v53_v21 = vld [vmem:[%s4471_s0 + $0x70] sm:$0xff] }
  0x89   :  { %2890 = vmatprep.mubr.f32.mxu0 %v3680_v3  ;;  %2923 = vmatprep.subr.mxu1 %v3650_v31  ;;  %v962_v30 = vsel %vm906_vm1, %v53_v21, 0 }
  0x8a   :  { %2933 = vmatprep.subr.mxu0 %v3450_v22 }
  0x8b   :  { %2891 = vmatmul.mubr.f32.gmra.mxu0 %v3684_v7 }
  0x8c   :  { %2924 = vmatpush3.xpose.msra.mxu1 %v3650_v31  ;;  %2934 = vmatpush3.xpose.msra.mxu0 %v3450_v22  ;;  %v4509_v22 = vld [vmem:[#allocation8_spill] sm:$0xff] }
  0x8d   :  { %2935 = vmatprep.subr.mxu0 %v3453_v23  ;;  %2969 = vmatprep.subr.mxu1 %v3418_v9 }
  0x8e   :  { %2963 = vmatprep.mubr.f32.mxu0 %v3533_v59 }
  0x8f   :  { %2926 = vmatmul.mubr.f32.vlgmr.msra.gmra.mxu1 %v4506_v17 }
  0x90   :  { %2936 = vmatpush3.xpose.msra.mxu0 %v3453_v23  ;;  %2970 = vmatpush3.xpose.msra.mxu1 %v3418_v9  ;;  %v4507_v9 = vld [vmem:[#allocation6_spill] sm:$0xff] }
  0x91   :  { %2928 = vmatprep.mubr.f32.mxu1 %v239_v29  ;;  %2937 = vmatprep.subr.mxu0 %v3476_v34 }
  0x92   :  { %2971 = vmatprep.subr.mxu1 %v3420_v10 }
  0x93   :  { %2929 = vmatmul.mubr.f32.gmra.mxu1 %v249_v42  ;;  %v947_v42 = vsel %vm906_vm1, %v48_v55, 0 }
  0x94   :  { %2938 = vmatpush3.xpose.msra.mxu0 %v3476_v34  ;;  %2972 = vmatpush3.xpose.msra.mxu1 %v3420_v10  ;;  %v54_v10 = vld [vmem:[%s4471_s0 + $0x78] sm:$0xff]  ;;  %v3953_v12 = vand.u32 4294901760, %v947_v42 }
  0x95   :  { %2939 = vmatprep.subr.mxu0 %v3491_v40  ;;  %2973 = vmatprep.subr.mxu1 %v3422_v11  ;;  %v965_v18 = vsel %vm906_vm1, %v54_v10, 0  ;;  %v4510_v34 = vld [vmem:[#allocation9_spill] sm:$0xff]  ;;  %v938_v10 = vsel %vm906_vm1, %v45_v5, 0 }
  0x96   :  { %3001 = vmatprep.mubr.f32.mxu1 %v3533_v59  ;;  %v3851_v23 = vand.u32 4294901760, %v965_v18  ;;  %v4010_v21 = vand.u32 4294901760, %v938_v10 }
  0x98   :  { %2940 = vmatpush3.xpose.msra.mxu0 %v3491_v40  ;;  %2974 = vmatpush3.xpose.msra.mxu1 %v3422_v11  ;;  %v35_v11 = vld [vmem:[%s4473_s2] sm:$0xff]  ;;  %v3865_v37 = vsub.f32 %v965_v18, %v3851_v23  ;;  %v3867_v40 = vand.u32 4294901760, %v962_v30 }
  0x99   :  { %2941 = vmatprep.subr.mxu0 %v3499_v43  ;;  %2975 = vmatprep.subr.mxu1 %v3428_v14 }
  0x9a   :  { %v3886_v57 = vsub.f32 %v962_v30, %v3867_v40  ;;  %v43_v30 = vld [vmem:[%s4471_s0 + $0x20] sm:$0xff] }
  0x9b   :  { %v932_v60 = vsel %vm906_vm1, %v43_v30, 0 }
  0x9c   :  { %2942 = vmatpush3.xpose.msra.mxu0 %v3499_v43  ;;  %2976 = vmatpush3.xpose.msra.mxu1 %v3428_v14  ;;  %v4508_v14 = vld [vmem:[#allocation7_spill] sm:$0xff] }
  0x9d   :  { %2943 = vmatprep.subr.mxu0 %v3522_v53  ;;  %2977 = vmatprep.subr.mxu1 %v3442_v19 }
  0xa0   :  { %2944 = vmatpush3.xpose.msra.mxu0 %v3522_v53  ;;  %2978 = vmatpush3.xpose.msra.mxu1 %v3442_v19  ;;  %v908_v19 = vsel %vm906_vm1, %v35_v11, 0  ;;  %v956_v53 = vsel %vm906_vm1, %v51_v44, 0  ;;  %v44_v11 = vld [vmem:[%s4471_s0 + $0x28] sm:$0xff] }
  0xa1   :  { %2945 = vmatprep.subr.mxu0 %v3547_v1  ;;  %2979 = vmatprep.subr.mxu1 %v3466_v28  ;;  %v3901_v2 = vand.u32 4294901760, %v956_v53 }
  0xa4   :  { %2946 = vmatpush3.xpose.msra.mxu0 %v3547_v1  ;;  %2980 = vmatpush3.xpose.msra.mxu1 %v3466_v28  ;;  %v3856_v28 = vand.u32 4294901760, %v908_v19 }
  0xa5   :  { %2947 = vmatprep.subr.mxu0 %v3570_v15  ;;  %2981 = vmatprep.subr.mxu1 %v3482_v36 }
  0xa6   :  { %v3870_v43 = vsub.f32 %v908_v19, %v3856_v28 }
  0xa8   :  { %2948 = vmatpush3.xpose.msra.mxu0 %v3570_v15  ;;  %2982 = vmatpush3.xpose.msra.mxu1 %v3482_v36  ;;  %v959_v36 = vsel %vm906_vm1, %v52_v24, 0  ;;  %v4491_v59 = vand.u32 4294901760, %v3870_v43  ;;  %v935_v24 = vsel %vm906_vm1, %v44_v11, 0  ;;  %v37_v11 = vld [vmem:[%s4473_s2 + $0x10] sm:$0xff] }
  0xa9   :  { %2949 = vmatprep.subr.mxu0 %v3583_v32  ;;  %2983 = vmatprep.subr.mxu1 %v3507_v47  ;;  %v4023_v44 = vand.u32 4294901760, %v935_v24 }
  0xaa   :  { %v1051_v15 = vsub.f32 %v3870_v43, %v4491_v59 }
  0xab   :  { %v4046_v55 = vsub.f32 %v935_v24, %v4023_v44 }
  0xac   :  { %2950 = vmatpush3.xpose.msra.mxu0 %v3583_v32  ;;  %2984 = vmatpush3.xpose.msra.mxu1 %v3507_v47  ;;  %v3877_v47 = vand.u32 4294901760, %v959_v36  ;;  %v1052_v56 = vand.u32 4294901760, %v1051_v15 }
  0xad   :  { %2951 = vmatprep.subr.mxu0 %v3599_v45  ;;  %2985 = vmatprep.subr.mxu1 %v3519_v52 }
  0xb0   :  { %2952 = vmatpush3.xpose.msra.mxu0 %v3599_v45  ;;  %2986 = vmatpush3.xpose.msra.mxu1 %v3519_v52  ;;  %v3882_v52 = vand.u32 4294901760, %v3865_v37  ;;  %v3924_v45 = vsub.f32 %v956_v53, %v3901_v2 }
  0xb1   :  { %2953 = vmatprep.subr.mxu0 %v4507_v9  ;;  %2987 = vmatprep.subr.mxu1 %v3540_v62 }
  0xb2   :  { %v1092_v1 = vsub.f32 %v3865_v37, %v3882_v52  ;;  %v3942_v20 = vand.u32 4294901760, %v3924_v45 }
  0xb4   :  { %2954 = vmatpush3.xpose.msra.mxu0 %v4507_v9  ;;  %2988 = vmatpush3.xpose.msra.mxu1 %v3540_v62  ;;  %v3895_v62 = vsub.f32 %v959_v36, %v3877_v47  ;;  %v1093_v33 = vand.u32 4294901760, %v1092_v1  ;;  %v1113_v3 = vsub.f32 %v3924_v45, %v3942_v20  ;;  %v4030_v1 = vsub.f32 %v938_v10, %v4010_v21  ;;  %v39_v10 = vld [vmem:[%s4471_s0] sm:$0xff] }
  0xb5   :  { %2955 = vmatprep.subr.mxu0 %v4508_v14  ;;  %2989 = vmatprep.subr.mxu1 %v3560_v6 }
  0xb6   :  { %v3917_v32 = vand.u32 4294901760, %v3895_v62  ;;  %v1114_v29 = vand.u32 4294901760, %v1113_v3 }
  0xb8   :  { %2956 = vmatpush3.xpose.msra.mxu0 %v4508_v14  ;;  %2990 = vmatpush3.xpose.msra.mxu1 %v3560_v6  ;;  %v3904_v6 = vand.u32 4294901760, %v3886_v57 }
  0xb9   :  { %2957 = vmatprep.subr.mxu0 %v4509_v22  ;;  %2991 = vmatprep.subr.mxu1 %v3576_v26 }
  0xba   :  { %v1099_v46 = vsub.f32 %v3886_v57, %v3904_v6 }
  0xbc   :  { %2958 = vmatpush3.xpose.msra.mxu0 %v4509_v22  ;;  %2992 = vmatpush3.xpose.msra.mxu1 %v3576_v26  ;;  %v49_v26 = vld [vmem:[%s4471_s0 + $0x50] sm:$0xff]  ;;  %v1100_v51 = vand.u32 4294901760, %v1099_v46  ;;  %v4042_v46 = vand.u32 4294901760, %v4030_v1 }
  0xbd   :  { %2959 = vmatprep.subr.mxu0 %v4510_v34  ;;  %2993 = vmatprep.subr.mxu1 %v3592_v38 }
  0xc0   :  { %2960 = vmatpush3.xpose.msra.mxu0 %v4510_v34  ;;  %2994 = vmatpush3.xpose.msra.mxu1 %v3592_v38  ;;  %v3921_v38 = vand.u32 4294901760, %v953_v8 }
  0xc1   :  { %2961 = vmatprep.subr.mxu0 %v3691_v0  ;;  %2995 = vmatprep.subr.mxu1 %v3608_v49 }
  0xc2   :  { %v3946_v48 = vsub.f32 %v953_v8, %v3921_v38  ;;  %v42_v8 = vld [vmem:[%s4471_s0 + $0x18] sm:$0xff] }
  0xc4   :  { %2962 = vmatpush3.xpose.msra.mxu0 %v3691_v0  ;;  %2996 = vmatpush3.xpose.msra.mxu1 %v3608_v49  ;;  %v950_v49 = vsel %vm906_vm1, %v49_v26, 0  ;;  %v3960_v25 = vand.u32 4294901760, %v3946_v48  ;;  %v3974_v0 = vsub.f32 %v947_v42, %v3953_v12  ;;  %v4036_v26 = vand.u32 4294901760, %v932_v60 }
  0xc5   :  { %2997 = vmatprep.subr.mxu1 %v3627_v63  ;;  %3007 = vmatprep.subr.mxu0 %v3851_v23  ;;  %v3939_v13 = vand.u32 4294901760, %v950_v49 }
  0xc6   :  { %v1120_v35 = vsub.f32 %v3946_v48, %v3960_v25  ;;  %v3989_v61 = vand.u32 4294901760, %v3974_v0  ;;  %v4055_v42 = vsub.f32 %v932_v60, %v4036_v26  ;;  %v38_v60 = vld [vmem:[%s4473_s2 + $0x18] sm:$0xff] }
  0xc7   :  { %2964 = vmatmul.mubr.f32.vlgmr.msra.gmra.mxu0 %v3646_v27 }
  0xc8   :  { %2998 = vmatpush3.xpose.msra.mxu1 %v3627_v63  ;;  %3008 = vmatpush3.xpose.msra.mxu0 %v3851_v23  ;;  %v1106_v63 = vsub.f32 %v3895_v62, %v3917_v32  ;;  %v1121_v16 = vand.u32 4294901760, %v1120_v35  ;;  %v1134_v14 = vsub.f32 %v3974_v0, %v3989_v61 }
  0xc9   :  { %2966 = vmatprep.mubr.f32.mxu0 %v3662_v54  ;;  %2999 = vmatprep.subr.mxu1 %v3650_v31 }
  0xca   :  { %3009 = vmatprep.subr.mxu0 %v3867_v40  ;;  %v1107_v50 = vand.u32 4294901760, %v1106_v63  ;;  %v1135_v34 = vand.u32 4294901760, %v1134_v14 }
  0xcb   :  { %2967 = vmatmul.mubr.f32.gmra.mxu0 %v3667_v58 }
  0xcc   :  { %3000 = vmatpush3.xpose.msra.mxu1 %v3650_v31  ;;  %3010 = vmatpush3.xpose.msra.mxu0 %v3867_v40  ;;  %v47_v31 = vld [vmem:[%s4471_s0 + $0x40] sm:$0xff] }
  0xcd   :  { %3011 = vmatprep.subr.mxu0 %v3877_v47  ;;  %3045 = vmatprep.subr.mxu1 %v1093_v33  ;;  %v944_v7 = vsel %vm906_vm1, %v47_v31, 0  ;;  %v1155_v31 = vsub.f32 %v4030_v1, %v4042_v46 }
  0xce   :  { %3039 = vmatprep.mubr.f32.mxu0 %v1052_v56  ;;  %v3971_v41 = vand.u32 4294901760, %v944_v7  ;;  %v41_v56 = vld [vmem:[%s4471_s0 + $0x10] sm:$0xff] }
  0xcf   :  { %3002 = vmatmul.mubr.f32.vlgmr.msra.gmra.mxu1 %v3646_v27  ;;  %v3964_v27 = vsub.f32 %v950_v49, %v3939_v13  ;;  %v929_v49 = vsel %vm906_vm1, %v42_v8, 0  ;;  %v926_v3 = vsel %vm906_vm1, %v41_v56, 0  ;;  %v1156_v35 = vand.u32 4294901760, %v1155_v31 }
  0xd0   :  { %3012 = vmatpush3.xpose.msra.mxu0 %v3877_v47  ;;  %3046 = vmatpush3.xpose.msra.mxu1 %v1093_v33  ;;  %v3992_v4 = vsub.f32 %v944_v7, %v3971_v41  ;;  %v4052_v63 = vand.u32 4294901760, %v929_v49  ;;  %v40_v7 = vld [vmem:[%s4471_s0 + $0x8] sm:$0xff]  ;;  %v4077_v5 = vand.u32 4294901760, %v926_v3  ;;  %v920_v8 = vsel %vm906_vm1, %v39_v10, 0 }
  0xd1   :  { %3004 = vmatprep.mubr.f32.mxu1 %v3662_v54  ;;  %3013 = vmatprep.subr.mxu0 %v3901_v2  ;;  %v46_v54 = vld [vmem:[%s4471_s0 + $0x38] sm:$0xff]  ;;  %v4114_v31 = vand.u32 4294901760, %v920_v8 }
  0xd2   :  { %3047 = vmatprep.subr.mxu1 %v1100_v51  ;;  %v941_v39 = vsel %vm906_vm1, %v46_v54, 0  ;;  %v4007_v18 = vand.u32 4294901760, %v3992_v4  ;;  %v4069_v54 = vand.u32 4294901760, %v4055_v42 }
  0xd3   :  { %3005 = vmatmul.mubr.f32.gmra.mxu1 %v3667_v58  ;;  %v3980_v58 = vand.u32 4294901760, %v3964_v27  ;;  %v3997_v9 = vand.u32 4294901760, %v941_v39 }
  0xd4   :  { %3014 = vmatpush3.xpose.msra.mxu0 %v3901_v2  ;;  %3048 = vmatpush3.xpose.msra.mxu1 %v1100_v51  ;;  %v1141_v36 = vsub.f32 %v3992_v4, %v4007_v18  ;;  %4511 = vst [vmem:[#allocation6_spill] sm:$0xff] %v4069_v54  ;;  %v1169_v14 = vsub.f32 %v4055_v42, %v4069_v54 }
  0xd5   :  { %3015 = vmatprep.subr.mxu0 %v3921_v38  ;;  %3049 = vmatprep.subr.mxu1 %v1107_v50  ;;  %v1127_v17 = vsub.f32 %v3964_v27, %v3980_v58  ;;  %v4013_v22 = vsub.f32 %v941_v39, %v3997_v9 }
  0xd6   :  { %3077 = vmatprep.mubr.f32.mxu1 %v3856_v28  ;;  %v1142_v15 = vand.u32 4294901760, %v1141_v36  ;;  %v4100_v36 = vsub.f32 %v926_v3, %v4077_v5 }
  0xd7   :  { %v1128_v19 = vand.u32 4294901760, %v1127_v17  ;;  %v4026_v53 = vand.u32 4294901760, %v4013_v22  ;;  %v923_v17 = vsel %vm906_vm1, %v40_v7, 0 }
  0xd8   :  { %3016 = vmatpush3.xpose.msra.mxu0 %v3921_v38  ;;  %3050 = vmatpush3.xpose.msra.mxu1 %v1107_v50  ;;  %v4061_v50 = vand.u32 4294901760, %v4046_v55  ;;  %v4117_v3 = vand.u32 4294901760, %v4100_v36 }
  0xd9   :  { %3017 = vmatprep.subr.mxu0 %v3939_v13  ;;  %3051 = vmatprep.subr.mxu1 %v1114_v29  ;;  %v1148_v33 = vsub.f32 %v4013_v22, %v4026_v53 }
  0xda   :  { %v1162_v39 = vsub.f32 %v4046_v55, %v4061_v50  ;;  %4513 = vst [vmem:[#allocation8_spill] sm:$0xff] %v4117_v3 }
  0xdb   :  { %v1149_v51 = vand.u32 4294901760, %v1148_v33 }
  0xdc   :  { %3018 = vmatpush3.xpose.msra.mxu0 %v3939_v13  ;;  %3052 = vmatpush3.xpose.msra.mxu1 %v1114_v29  ;;  %v4072_v29 = vsub.f32 %v929_v49, %v4052_v63  ;;  %v1163_v30 = vand.u32 4294901760, %v1162_v39  ;;  %v1170_v49 = vand.u32 4294901760, %v1169_v14 }
  0xdd   :  { %3019 = vmatprep.subr.mxu0 %v3953_v12  ;;  %3053 = vmatprep.subr.mxu1 %v1121_v16 }
  0xe0   :  { %3020 = vmatpush3.xpose.msra.mxu0 %v3953_v12  ;;  %3054 = vmatpush3.xpose.msra.mxu1 %v1121_v16  ;;  %v36_v16 = vld [vmem:[%s4473_s2 + $0x8] sm:$0xff] }
  0xe1   :  { %3021 = vmatprep.subr.mxu0 %v3971_v41  ;;  %3055 = vmatprep.subr.mxu1 %v1128_v19  ;;  %v911_v24 = vsel %vm906_vm1, %v36_v16, 0 }
  0xe2   :  { %v4107_v33 = vand.u32 4294901760, %v911_v24 }
  0xe4   :  { %3022 = vmatpush3.xpose.msra.mxu0 %v3971_v41  ;;  %3056 = vmatpush3.xpose.msra.mxu1 %v1128_v19  ;;  %v4093_v19 = vand.u32 4294901760, %v4072_v29 }
  0xe5   :  { %3023 = vmatprep.subr.mxu0 %v3997_v9  ;;  %3057 = vmatprep.subr.mxu1 %v1135_v34 }
  0xe6   :  { %4512 = vst [vmem:[#allocation7_spill] sm:$0xff] %v4093_v19  ;;  %v1176_v56 = vsub.f32 %v4072_v29, %v4093_v19 }
  0xe8   :  { %3024 = vmatpush3.xpose.msra.mxu0 %v3997_v9  ;;  %3058 = vmatpush3.xpose.msra.mxu1 %v1135_v34  ;;  %v4097_v34 = vand.u32 4294901760, %v923_v17  ;;  %v1177_v10 = vand.u32 4294901760, %v1176_v56 }
  0xe9   :  { %3025 = vmatprep.subr.mxu0 %v4010_v21  ;;  %3059 = vmatprep.subr.mxu1 %v1142_v15 }
  0xea   :  { %v4120_v7 = vsub.f32 %v923_v17, %v4097_v34 }
  0xec   :  { %3026 = vmatpush3.xpose.msra.mxu0 %v4010_v21  ;;  %3060 = vmatpush3.xpose.msra.mxu1 %v1142_v15  ;;  %v914_v15 = vsel %vm906_vm1, %v37_v11, 0  ;;  %v1183_v11 = vsub.f32 %v4100_v36, %v4117_v3  ;;  %v4134_v17 = vand.u32 4294901760, %v4120_v7 }
  0xed   :  { %3027 = vmatprep.subr.mxu0 %v4023_v44  ;;  %3061 = vmatprep.subr.mxu1 %v1149_v51  ;;  %v4122_v39 = vand.u32 4294901760, %v914_v15 }
  0xee   :  { %4514 = vst [vmem:[#allocation9_spill] sm:$0xff] %v4134_v17  ;;  %v1184_v56 = vand.u32 4294901760, %v1183_v11  ;;  %v1190_v59 = vsub.f32 %v4120_v7, %v4134_v17 }
  0xef   :  { %v4137_v14 = vsub.f32 %v914_v15, %v4122_v39 }
  0xf0   :  { %3028 = vmatpush3.xpose.msra.mxu0 %v4023_v44  ;;  %3062 = vmatpush3.xpose.msra.mxu1 %v1149_v51  ;;  %v917_v51 = vsel %vm906_vm1, %v38_v60, 0 }
  0xf1   :  { %3029 = vmatprep.subr.mxu0 %v4036_v26  ;;  %3063 = vmatprep.subr.mxu1 %v1156_v35  ;;  %v4127_v16 = vand.u32 4294901760, %v917_v51  ;;  %v1070_v15 = vand.u32 4294901760, %v4137_v14 }
  0xf3   :  { %v1071_v11 = vsub.f32 %v4137_v14, %v1070_v15 }
  0xf4   :  { %3030 = vmatpush3.xpose.msra.mxu0 %v4036_v26  ;;  %3064 = vmatpush3.xpose.msra.mxu1 %v1156_v35  ;;  %v4125_v35 = vsub.f32 %v911_v24, %v4107_v33  ;;  %v4140_v24 = vsub.f32 %v920_v8, %v4114_v31 }
  0xf5   :  { %3031 = vmatprep.subr.mxu0 %v4052_v63  ;;  %3065 = vmatprep.subr.mxu1 %v1163_v30 }
  0xf6   :  { %v4498_v60 = vand.u32 4294901760, %v4125_v35  ;;  %v4152_v8 = vand.u32 4294901760, %v4140_v24 }
  0xf8   :  { %3032 = vmatpush3.xpose.msra.mxu0 %v4052_v63  ;;  %3066 = vmatpush3.xpose.msra.mxu1 %v1163_v30  ;;  %v4144_v30 = vsub.f32 %v917_v51, %v4127_v16  ;;  %v1061_v51 = vsub.f32 %v4125_v35, %v4498_v60  ;;  %v1197_v17 = vsub.f32 %v4140_v24, %v4152_v8 }
  0xf9   :  { %3033 = vmatprep.subr.mxu0 %v4077_v5  ;;  %3067 = vmatprep.subr.mxu1 %v1170_v49 }
  0xfa   :  { %v1080_v3 = vand.u32 4294901760, %v4144_v30  ;;  %v1062_v19 = vand.u32 4294901760, %v1061_v51 }
  0xfc   :  { %3034 = vmatpush3.xpose.msra.mxu0 %v4077_v5  ;;  %3068 = vmatpush3.xpose.msra.mxu1 %v1170_v49  ;;  %v1191_v49 = vand.u32 4294901760, %v1190_v59  ;;  %v1081_v60 = vsub.f32 %v4144_v30, %v1080_v3  ;;  %v1198_v59 = vand.u32 4294901760, %v1197_v17 }
  0xfd   :  { %3035 = vmatprep.subr.mxu0 %v4097_v34  ;;  %3069 = vmatprep.subr.mxu1 %v1177_v10 }
  0xfe   :  { %v1082_v54 = vand.u32 4294901760, %v1081_v60 }
 0x100   :  { %3036 = vmatpush3.xpose.msra.mxu0 %v4097_v34  ;;  %3070 = vmatpush3.xpose.msra.mxu1 %v1177_v10  ;;  %v1072_v10 = vand.u32 4294901760, %v1071_v11 }
 0x101   :  { %3037 = vmatprep.subr.mxu0 %v4114_v31  ;;  %3071 = vmatprep.subr.mxu1 %v1184_v56 }
 0x104   :  { %3038 = vmatpush3.xpose.msra.mxu0 %v4114_v31  ;;  %3072 = vmatpush3.xpose.msra.mxu1 %v1184_v56 }
 0x105   :  { %3073 = vmatprep.subr.mxu1 %v1191_v49  ;;  %3083 = vmatprep.subr.mxu0 %v3865_v37 }
 0x107   :  { %3040 = vmatmul.mubr.f32.vlgmr.msra.gmra.mxu0 %v1062_v19 }
 0x108   :  { %3074 = vmatpush3.xpose.msra.mxu1 %v1191_v49  ;;  %3084 = vmatpush3.xpose.msra.mxu0 %v3865_v37  ;;  %v4515_v37 = vand.u32 4294901760, %v3870_v43 }
 0x109   :  { %3042 = vmatprep.mubr.f32.mxu0 %v1072_v10  ;;  %3075 = vmatprep.subr.mxu1 %v1198_v59 }
 0x10a   :  { %3085 = vmatprep.subr.mxu0 %v3886_v57 }
 0x10b   :  { %3043 = vmatmul.mubr.f32.gmra.mxu0 %v1082_v54 }
 0x10c   :  { %3076 = vmatpush3.xpose.msra.mxu1 %v1198_v59  ;;  %3086 = vmatpush3.xpose.msra.mxu0 %v3886_v57  ;;  %v3345_v57 = vmov 0  }
 0x10d   :  { %3087 = vmatprep.subr.mxu0 %v3895_v62  ;;  %3121 = vmatprep.subr.mxu1 %v3851_v23 }
 0x10e   :  { %3115 = vmatprep.mubr.f32.mxu0 %v3870_v43  ;;  %3321 = vset.pattern.permute.xlu0 %v3345_v57  ;;  %v1739_v43 = vld [vmem:[%s4475_s4 + $0x10] sm:$0xff] }
 0x10f   :  { %3078 = vmatmul.mubr.f32.vlgmr.msra.gmra.mxu1 %v4107_v33  ;;  %3322 = vset.pattern.permute.xlu1 %v3345_v57 }
 0x110   :  { %3088 = vmatpush3.xpose.msra.mxu0 %v3895_v62  ;;  %3122 = vmatpush3.xpose.msra.mxu1 %v3851_v23  ;;  %v1740_v62 = vld [vmem:[%s4475_s4 + $0x18] sm:$0xff] }
 0x111   :  { %3080 = vmatprep.mubr.f32.mxu1 %v4122_v39  ;;  %3089 = vmatprep.subr.mxu0 %v3924_v45 }
 0x112   :  { %3123 = vmatprep.subr.mxu1 %v3867_v40  ;;  %1758 = vperm.xlu0 %3321, %v1740_v62  }
 0x113   :  { %3081 = vmatmul.mubr.f32.gmra.mxu1 %v4127_v16 }
 0x114   :  { %3090 = vmatpush3.xpose.msra.mxu0 %v3924_v45  ;;  %3124 = vmatpush3.xpose.msra.mxu1 %v3867_v40  ;;  %v1773_v45 = vld [vmem:[%s4477_s6] sm:$0xff] }
 0x115   :  { %3091 = vmatprep.subr.mxu0 %v3946_v48  ;;  %3125 = vmatprep.subr.mxu1 %v3877_v47 }
 0x116   :  { %3153 = vmatprep.mubr.f32.mxu1 %v4515_v37  ;;  %1753 = vperm.xlu0 %3321, %v1739_v43  }
 0x118   :  { %3092 = vmatpush3.xpose.msra.mxu0 %v3946_v48  ;;  %3126 = vmatpush3.xpose.msra.mxu1 %v3877_v47  ;;  %v1738_v48 = vld [vmem:[%s4475_s4 + $0x8] sm:$0xff] }
 0x119   :  { %3093 = vmatprep.subr.mxu0 %v3964_v27  ;;  %3127 = vmatprep.subr.mxu1 %v3901_v2 }
 0x11a   :  { %1779 = vperm.xlu0 %3321, %v1773_v45   ;;  %1748 = vperm.xlu1 %3322, %v1738_v48  }
 0x11c   :  { %3094 = vmatpush3.xpose.msra.mxu0 %v3964_v27  ;;  %3128 = vmatpush3.xpose.msra.mxu1 %v3901_v2  ;;  %v1775_v27 = vld [vmem:[%s4477_s6 + $0x10] sm:$0xff] }
 0x11d   :  { %3095 = vmatprep.subr.mxu0 %v3974_v0  ;;  %3129 = vmatprep.subr.mxu1 %v3921_v38 }
 0x11e   :  { %1789 = vperm.xlu0 %3321, %v1775_v27  }
 0x120   :  { %3096 = vmatpush3.xpose.msra.mxu0 %v3974_v0  ;;  %3130 = vmatpush3.xpose.msra.mxu1 %v3921_v38  ;;  %v4516_v0 = vand.u32 4294901760, %v4125_v35 }
 0x121   :  { %3097 = vmatprep.subr.mxu0 %v3992_v4  ;;  %3131 = vmatprep.subr.mxu1 %v3939_v13 }
 0x124   :  { %3098 = vmatpush3.xpose.msra.mxu0 %v3992_v4  ;;  %3132 = vmatpush3.xpose.msra.mxu1 %v3939_v13  ;;  %v2428_v4 = vld [vmem:[%s4478_s7] sm:$0xff] }
 0x125   :  { %3099 = vmatprep.subr.mxu0 %v4013_v22  ;;  %3133 = vmatprep.subr.mxu1 %v3953_v12 }
 0x126   :  { %2434 = vperm.xlu0 %3321, %v2428_v4  }
 0x128   :  { %3100 = vmatpush3.xpose.msra.mxu0 %v4013_v22  ;;  %3134 = vmatpush3.xpose.msra.mxu1 %v3953_v12  ;;  %v2465_v22 = vld [vmem:[#allocation2] sm:$0x1] }
 0x129   :  { %3101 = vmatprep.subr.mxu0 %v4030_v1  ;;  %3135 = vmatprep.subr.mxu1 %v3971_v41 }
 0x12c   :  { %3102 = vmatpush3.xpose.msra.mxu0 %v4030_v1  ;;  %3136 = vmatpush3.xpose.msra.mxu1 %v3971_v41 }
 0x12d   :  { %3103 = vmatprep.subr.mxu0 %v4046_v55  ;;  %3137 = vmatprep.subr.mxu1 %v3997_v9 }
 0x130   :  { %3104 = vmatpush3.xpose.msra.mxu0 %v4046_v55  ;;  %3138 = vmatpush3.xpose.msra.mxu1 %v3997_v9 }
 0x131   :  { %3105 = vmatprep.subr.mxu0 %v4055_v42  ;;  %3139 = vmatprep.subr.mxu1 %v4010_v21 }
 0x134   :  { %3106 = vmatpush3.xpose.msra.mxu0 %v4055_v42  ;;  %3140 = vmatpush3.xpose.msra.mxu1 %v4010_v21 }
 0x135   :  { %3107 = vmatprep.subr.mxu0 %v4072_v29  ;;  %3141 = vmatprep.subr.mxu1 %v4023_v44 }
 0x138   :  { %3108 = vmatpush3.xpose.msra.mxu0 %v4072_v29  ;;  %3142 = vmatpush3.xpose.msra.mxu1 %v4023_v44 }
 0x139   :  { %3109 = vmatprep.subr.mxu0 %v4100_v36  ;;  %3143 = vmatprep.subr.mxu1 %v4036_v26 }
 0x13c   :  { %3110 = vmatpush3.xpose.msra.mxu0 %v4100_v36  ;;  %3144 = vmatpush3.xpose.msra.mxu1 %v4036_v26 }
 0x13d   :  { %3111 = vmatprep.subr.mxu0 %v4120_v7  ;;  %3145 = vmatprep.subr.mxu1 %v4052_v63 }
 0x140   :  { %3112 = vmatpush3.xpose.msra.mxu0 %v4120_v7  ;;  %3146 = vmatpush3.xpose.msra.mxu1 %v4052_v63 }
 0x141   :  { %3113 = vmatprep.subr.mxu0 %v4140_v24  ;;  %3147 = vmatprep.subr.mxu1 %v4077_v5 }
 0x144   :  { %3114 = vmatpush3.xpose.msra.mxu0 %v4140_v24  ;;  %3148 = vmatpush3.xpose.msra.mxu1 %v4077_v5 }
 0x145   :  { %3149 = vmatprep.subr.mxu1 %v4097_v34  ;;  %3159 = vmatprep.subr.mxu0 %v3882_v52 }
 0x147   :  { %3116 = vmatmul.mubr.f32.vlgmr.msra.gmra.mxu0 %v4125_v35 }
 0x148   :  { %3150 = vmatpush3.xpose.msra.mxu1 %v4097_v34  ;;  %3160 = vmatpush3.xpose.msra.mxu0 %v3882_v52  ;;  %v1737_v52 = vld [vmem:[%s4475_s4] sm:$0xff] }
 0x149   :  { %3118 = vmatprep.mubr.f32.mxu0 %v4137_v14  ;;  %3151 = vmatprep.subr.mxu1 %v4114_v31 }
 0x14a   :  { %3161 = vmatprep.subr.mxu0 %v3904_v6  ;;  %1743 = vperm.xlu1 %3322, %v1737_v52  }
 0x14b   :  { %3119 = vmatmul.mubr.f32.gmra.mxu0 %v4144_v30 }
 0x14c   :  { %3152 = vmatpush3.xpose.msra.mxu1 %v4114_v31  ;;  %3162 = vmatpush3.xpose.msra.mxu0 %v3904_v6  ;;  %v1774_v6 = vld [vmem:[%s4477_s6 + $0x8] sm:$0xff] }
 0x14d   :  { %3163 = vmatprep.subr.mxu0 %v3917_v32  ;;  %3197 = vmatprep.subr.mxu1 %v3851_v23 }
 0x14e   :  { %3191 = vmatprep.mubr.f32.mxu0 %v3856_v28  ;;  %1784 = vperm.xlu1 %3322, %v1774_v6  }
 0x14f   :  { %3154 = vmatmul.mubr.f32.vlgmr.msra.gmra.mxu1 %v4516_v0 }
 0x150   :  { %3164 = vmatpush3.xpose.msra.mxu0 %v3917_v32  ;;  %3198 = vmatpush3.xpose.msra.mxu1 %v3851_v23  ;;  %v2430_v23 = vld [vmem:[%s4478_s7 + $0x10] sm:$0xff]  ;;  %v1776_v32 = vld [vmem:[%s4477_s6 + $0x18] sm:$0xff] }
 0x151   :  { %3156 = vmatprep.mubr.f32.mxu1 %v1070_v15  ;;  %3165 = vmatprep.subr.mxu0 %v3942_v20 }
 0x152   :  { %3199 = vmatprep.subr.mxu1 %v3867_v40  ;;  %2444 = vperm.xlu0 %3321, %v2430_v23  }
 0x153   :  { %3157 = vmatmul.mubr.f32.gmra.mxu1 %v1080_v3  ;;  %1794 = vperm.xlu1 %3322, %v1776_v32  }
 0x154   :  { %3166 = vmatpush3.xpose.msra.mxu0 %v3942_v20  ;;  %3200 = vmatpush3.xpose.msra.mxu1 %v3867_v40  ;;  %v2429_v40 = vld [vmem:[%s4478_s7 + $0x8] sm:$0xff]  ;;  %v1769_v20 = vld [vmem:[%s4476_s5] sm:$0xff] }
 0x155   :  { %3167 = vmatprep.subr.mxu0 %v3960_v25  ;;  %3201 = vmatprep.subr.mxu1 %v3877_v47 }
 0x156   :  { %3229 = vmatprep.mubr.f32.mxu1 %v3856_v28  ;;  %2468 = vperm.xlu0 %3321, %v2465_v22   ;;  %v2431_v28 = vld [vmem:[%s4478_s7 + $0x18] sm:$0xff] }
 0x157   :  { %2439 = vperm.xlu1 %3322, %v2429_v40  }
 0x158   :  { %3168 = vmatpush3.xpose.msra.mxu0 %v3960_v25  ;;  %3202 = vmatpush3.xpose.msra.mxu1 %v3877_v47  ;;  %v4517_v47 = vld [vmem:[#allocation6_spill] sm:$0xff] }
 0x159   :  { %3169 = vmatprep.subr.mxu0 %v3980_v58  ;;  %3203 = vmatprep.subr.mxu1 %v3901_v2 }
 0x15b   :  { %2449 = vperm.xlu1 %3322, %v2431_v28  }
 0x15c   :  { %3170 = vmatpush3.xpose.msra.mxu0 %v3980_v58  ;;  %3204 = vmatpush3.xpose.msra.mxu1 %v3901_v2  ;;  %v4518_v2 = vld [vmem:[#allocation7_spill] sm:$0xff] }
 0x15d   :  { %3171 = vmatprep.subr.mxu0 %v3989_v61  ;;  %3205 = vmatprep.subr.mxu1 %v3921_v38 }
 0x160   :  { %3172 = vmatpush3.xpose.msra.mxu0 %v3989_v61  ;;  %3206 = vmatpush3.xpose.msra.mxu1 %v3921_v38  ;;  %v4519_v38 = vld [vmem:[#allocation8_spill] sm:$0xff] }
 0x161   :  { %3173 = vmatprep.subr.mxu0 %v4007_v18  ;;  %3207 = vmatprep.subr.mxu1 %v3939_v13 }
 0x164   :  { %3174 = vmatpush3.xpose.msra.mxu0 %v4007_v18  ;;  %3208 = vmatpush3.xpose.msra.mxu1 %v3939_v13  ;;  %v4520_v13 = vld [vmem:[#allocation9_spill] sm:$0xff]  ;;  %v2813_v18 = vpop.f32.mrf.mxu0 }
 0x165   :  { %3175 = vmatprep.subr.mxu0 %v4026_v53  ;;  %3209 = vmatprep.subr.mxu1 %v3953_v12 }
 0x168   :  { %3176 = vmatpush3.xpose.msra.mxu0 %v4026_v53  ;;  %3210 = vmatpush3.xpose.msra.mxu1 %v3953_v12  ;;  %v1799_v12 = vsel %vm1797_vm2, %v1769_v20, 0  ;;  %v2851_v53 = vpop.f32.mrf.mxu1 }
 0x169   :  { %3177 = vmatprep.subr.mxu0 %v4042_v46  ;;  %3211 = vmatprep.subr.mxu1 %v3971_v41  ;;  %v4360_v25 = vand.u32 4294901760, %v1799_v12  ;;  %v411_v51 = vadd.f32 %v2851_v53, %v2813_v18  ;;  %v1770_v53 = vld [vmem:[%s4476_s5 + $0x8] sm:$0xff] }
 0x16c   :  { %3178 = vmatpush3.xpose.msra.mxu0 %v4042_v46  ;;  %3212 = vmatpush3.xpose.msra.mxu1 %v3971_v41  ;;  %v4363_v41 = vsub.f32 %v1799_v12, %v4360_v25 }
 0x16d   :  { %3179 = vmatprep.subr.mxu0 %v4061_v50  ;;  %3213 = vmatprep.subr.mxu1 %v3997_v9 }
 0x16e   :  { %v1881_v58 = vand.u32 4294901760, %v4363_v41 }
 0x170   :  { %3180 = vmatpush3.xpose.msra.mxu0 %v4061_v50  ;;  %3214 = vmatpush3.xpose.msra.mxu1 %v3997_v9  ;;  %v1882_v61 = vsub.f32 %v4363_v41, %v1881_v58 }
 0x171   :  { %3181 = vmatprep.subr.mxu0 %v4517_v47  ;;  %3215 = vmatprep.subr.mxu1 %v4010_v21 }
 0x172   :  { %v1883_v9 = vand.u32 4294901760, %v1882_v61 }
 0x174   :  { %3182 = vmatpush3.xpose.msra.mxu0 %v4517_v47  ;;  %3216 = vmatpush3.xpose.msra.mxu1 %v4010_v21  ;;  %v223_v21 = vpop.f32.mrf.mxu0 }
 0x175   :  { %3183 = vmatprep.subr.mxu0 %v4518_v2  ;;  %3217 = vmatprep.subr.mxu1 %v4023_v44 }
 0x178   :  { %3184 = vmatpush3.xpose.msra.mxu0 %v4518_v2  ;;  %3218 = vmatpush3.xpose.msra.mxu1 %v4023_v44  ;;  %v2816_v44 = vpop.f32.mrf.mxu0 }
 0x179   :  { %3185 = vmatprep.subr.mxu0 %v4519_v38  ;;  %3219 = vmatprep.subr.mxu1 %v4036_v26 }
 0x17a   :  { %v243_v1 = vpop.f32.mrf.mxu0 }
 0x17c   :  { %3186 = vmatpush3.xpose.msra.mxu0 %v4519_v38  ;;  %3220 = vmatpush3.xpose.msra.mxu1 %v4036_v26  ;;  %v404_v26 = vpop.f32.mrf.mxu1  ;;  %v2889_v46 = vpop.f32.mrf.mxu0 }
 0x17d   :  { %3187 = vmatprep.subr.mxu0 %v4520_v13  ;;  %3221 = vmatprep.subr.mxu1 %v4052_v63  ;;  %v405_v11 = vadd.f32 %v404_v26, %v223_v21  ;;  %v534_v10 = vadd.f32 %v2889_v46, %v411_v51 }
 0x17e   :  { %v2854_v55 = vpop.f32.mrf.mxu1 }
 0x17f   :  { %v423_v59 = vadd.f32 %v2854_v55, %v2816_v44 }
 0x180   :  { %3188 = vmatpush3.xpose.msra.mxu0 %v4520_v13  ;;  %3222 = vmatpush3.xpose.msra.mxu1 %v4052_v63  ;;  %v526_v63 = vpop.f32.mrf.mxu0  ;;  %v416_v42 = vpop.f32.mrf.mxu1 }
 0x181   :  { %3189 = vmatprep.subr.mxu0 %v4152_v8  ;;  %3223 = vmatprep.subr.mxu1 %v4077_v5  ;;  %v417_v37 = vadd.f32 %v416_v42, %v243_v1  ;;  %v527_v62 = vadd.f32 %v526_v63, %v405_v11 }
 0x182   :  { %v2892_v50 = vpop.f32.mrf.mxu0  ;;  %v2927_v54 = vpop.f32.mrf.mxu1 }
 0x183   :  { %v645_v43 = vadd.f32 %v2927_v54, %v534_v10  ;;  %v548_v27 = vadd.f32 %v2892_v50, %v423_v59 }
 0x184   :  { %3190 = vmatpush3.xpose.msra.mxu0 %v4152_v8  ;;  %3224 = vmatpush3.xpose.msra.mxu1 %v4077_v5  ;;  %v540_v29 = vpop.f32.mrf.mxu0  ;;  %v636_v5 = vpop.f32.mrf.mxu1 }
 0x185   :  { %3225 = vmatprep.subr.mxu1 %v4097_v34  ;;  %v637_v52 = vadd.f32 %v636_v5, %v527_v62  ;;  %v541_v4 = vadd.f32 %v540_v29, %v417_v37  ;;  %v1802_v29 = vsel %vm1797_vm2, %v1770_v53, 0  ;;  %v1771_v5 = vld [vmem:[%s4476_s5 + $0x10] sm:$0xff] }
 0x187   :  { %3192 = vmatmul.mubr.f32.vlgmr.msra.gmra.mxu0 %v4107_v33  ;;  %v2965_v19 = vpop.f32.mrf.mxu0 }
 0x188   :  { %3226 = vmatpush3.xpose.msra.mxu1 %v4097_v34  ;;  %3194 = vmatprep.mubr.f32.mxu0 %v4122_v39  ;;  %v2930_v34 = vpop.f32.mrf.mxu1  ;;  %v786_v0 = vadd.f32 %v2965_v19, %v645_v43 }
 0x189   :  { %3227 = vmatprep.subr.mxu1 %v4114_v31  ;;  %v779_v36 = vpop.f32.mrf.mxu0  ;;  %v661_v6 = vadd.f32 %v2930_v34, %v548_v27 }
 0x18a   :  { %v780_v23 = vadd.f32 %v779_v36, %v637_v52 }
 0x18b   :  { %3195 = vmatmul.mubr.f32.gmra.mxu0 %v4127_v16 }
 0x18c   :  { %3228 = vmatpush3.xpose.msra.mxu1 %v4114_v31  ;;  %3243 = vmatprep.mubr.f32.mxu0 %v1883_v9  ;;  %v2968_v31 = vpop.f32.mrf.mxu0 }
 0x18d   :  { %v798_v47 = vadd.f32 %v2968_v31, %v661_v6 }
 0x18e   :  { %v791_v7 = vpop.f32.mrf.mxu0 }
 0x18f   :  { %3230 = vmatmul.mubr.f32.vlgmr.msra.gmra.mxu1 %v4107_v33  ;;  %v652_v33 = vpop.f32.mrf.mxu1 }
 0x190   :  { %3232 = vmatprep.mubr.f32.mxu1 %v4122_v39  ;;  %v653_v22 = vadd.f32 %v652_v33, %v541_v4 }
 0x191   :  { %v3003_v3 = vpop.f32.mrf.mxu1 }
 0x192   :  { %v891_v32 = vadd.f32 %v3003_v3, %v786_v0  ;;  %v792_v13 = vadd.f32 %v791_v7, %v653_v22  ;;  %v1772_v7 = vld [vmem:[%s4476_s5 + $0x18] sm:$0xff]  ;;  %s3346_s5 = smov [#allocation3]  }
 0x193   :  { %3233 = vmatmul.mubr.f32.gmra.mxu1 %v4127_v16  ;;  %v884_v39 = vpop.f32.mrf.mxu1  ;;  %s2483_s21 = sshll.u32 %s3346_s5, 4  ;;  %s2484_s21 = int_to_ptr.vmem [resolvable:$true] %s2483_s21 }
 0x194   :  { %3257 = vmatprep.mubr.f32.mxu1 %v4360_v25  ;;  %v885_v2 = vadd.f32 %v884_v39, %v780_v23  ;;  %s3323_s22 = scalar_lea.vmem %s2484_s21, 16  ;;  %s3327_s23 = scalar_lea.vmem %s2484_s21, 32 }
 0x195   :  { %v3006_v16 = vpop.f32.mrf.mxu1  ;;  %v1749_v54 = vpop.permute.xlu1 %1748  ;;  %p3324_p0 = scmp.ne.s32.totalorder %s2484_s21, %s3323_s22  ;;  %p3328_p1 = scmp.lt.s32.totalorder %s2484_s21, %s2484_s21 }
 0x196   :  { %v903_v12 = vadd.f32 %v3006_v16, %v798_v47  ;;  %v1805_v16 = vsel %vm1797_vm2, %v1771_v5, 0  ;;  %p3329_p2 = scmp.lt.s32.totalorder %s3327_s23, %s3323_s22 }
 0x197   :  { %v896_v14 = vpop.f32.mrf.mxu1  ;;  %v4387_v62 = vand.u32 4294901760, %v1805_v16 }
 0x198   :  { %v897_v18 = vadd.f32 %v896_v14, %v792_v13  ;;  %p3330_p3 = por %p3329_p2, %p3328_p1 }
 0x19a   :  { %p3331_p4 = pnand %p3330_p3, %p3324_p0 }
 0x1c5   :  { %v1744_v59 = vpop.permute.xlu1 %1743 }
 0x1c7   :  { %v3041_v35 = vpop.f32.mrf.mxu0 }
 0x1c8   :  { %v1065_v38 = vadd.f32 %v3041_v35, %v891_v32  ;;  %v4380_v35 = vand.u32 4294901760, %v1802_v29 }
 0x1c9   :  { %v1054_v17 = vpop.f32.mrf.mxu0 }
 0x1ca   :  { %v1055_v61 = vadd.f32 %v1054_v17, %v885_v2 }
 0x1cb   :  { %v3044_v24 = vpop.f32.mrf.mxu0 }
 0x1cc   :  { %v1085_v1 = vadd.f32 %v3044_v24, %v903_v12  ;;  %v1759_v24 = vpop.permute.xlu0 %1758 }
 0x1cd   :  { %v1074_v30 = vpop.f32.mrf.mxu0 }
 0x1ce   :  { %v1075_v55 = vadd.f32 %v1074_v30, %v897_v18 }
 0x1cf   :  { %v3079_v60 = vpop.f32.mrf.mxu1 }
 0x1d0   :  { %v1242_v9 = vadd.f32 %v3079_v60, %v1065_v38  ;;  %v1754_v32 = vpop.permute.xlu0 %1753 }
 0x1d1   :  { %v1235_v56 = vpop.f32.mrf.mxu1 }
 0x1d2   :  { %v1236_v26 = vadd.f32 %v1235_v56, %v1055_v61 }
 0x1d3   :  { %v3082_v8 = vpop.f32.mrf.mxu1 }
 0x1d4   :  { %v1254_v63 = vadd.f32 %v3082_v8, %v1085_v1  ;;  %v1808_v8 = vsel %vm1797_vm2, %v1772_v7, 0 }
 0x1d5   :  { %v1247_v57 = vpop.f32.mrf.mxu1  ;;  %v4389_v0 = vand.u32 4294901760, %v1808_v8 }
 0x1d6   :  { %v1248_v36 = vadd.f32 %v1247_v57, %v1075_v55  ;;  %v4385_v57 = vsub.f32 %v1802_v29, %v4380_v35 }
 0x1d7   :  { %v4400_v13 = vsub.f32 %v1808_v8, %v4389_v0 }
 0x1d8   :  { %v1891_v2 = vand.u32 4294901760, %v4385_v57 }
 0x1d9   :  { %v1911_v1 = vand.u32 4294901760, %v4400_v13 }
 0x1db   :  { %v1912_v29 = vsub.f32 %v4400_v13, %v1911_v1 }
 0x207   :  { %v3117_v15 = vpop.f32.mrf.mxu0 }
 0x208   :  { %v1365_v46 = vadd.f32 %v3117_v15, %v1242_v9 }
 0x209   :  { %v1357_v49 = vpop.f32.mrf.mxu0 }
 0x20a   :  { %v1358_v42 = vadd.f32 %v1357_v49, %v1236_v26 }
 0x20b   :  { %v3120_v45 = vpop.f32.mrf.mxu0 }
 0x20c   :  { %v1379_v33 = vadd.f32 %v3120_v45, %v1254_v63 }
 0x20d   :  { %v1371_v40 = vpop.f32.mrf.mxu0 }
 0x20e   :  { %v1372_v17 = vadd.f32 %v1371_v40, %v1248_v36  ;;  %v4394_v40 = vsub.f32 %v1805_v16, %v4387_v62 }
 0x20f   :  { %v3155_v48 = vpop.f32.mrf.mxu1 }
 0x210   :  { %v1476_v50 = vadd.f32 %v3155_v48, %v1365_v46  ;;  %v1901_v9 = vand.u32 4294901760, %v4394_v40 }
 0x211   :  { %v1467_v28 = vpop.f32.mrf.mxu1 }
 0x212   :  { %v1468_v31 = vadd.f32 %v1467_v28, %v1358_v42  ;;  %v1902_v55 = vsub.f32 %v4394_v40, %v1901_v9 }
 0x213   :  { %v3158_v21 = vpop.f32.mrf.mxu1 }
 0x214   :  { %v1492_v14 = vadd.f32 %v3158_v21, %v1379_v33  ;;  %v1903_v36 = vand.u32 4294901760, %v1902_v55 }
 0x215   :  { %v1483_v19 = vpop.f32.mrf.mxu1 }
 0x216   :  { %v1484_v51 = vadd.f32 %v1483_v19, %v1372_v17 }
 0x247   :  { %v3193_v20 = vpop.f32.mrf.mxu0 }
 0x248   :  { %v1617_v3 = vadd.f32 %v3193_v20, %v1476_v50 }
 0x249   :  { %v1610_v44 = vpop.f32.mrf.mxu0 }
 0x24a   :  { %v1611_v60 = vadd.f32 %v1610_v44, %v1468_v31  ;;  %v1892_v44 = vsub.f32 %v4385_v57, %v1891_v2 }
 0x24b   :  { %v3196_v34 = vpop.f32.mrf.mxu0 }
 0x24c   :  { %v1629_v49 = vadd.f32 %v3196_v34, %v1492_v14  ;;  %v1893_v42 = vand.u32 4294901760, %v1892_v44 }
 0x24d   :  { %v1622_v56 = vpop.f32.mrf.mxu0 }
 0x24e   :  { %v1623_v43 = vadd.f32 %v1622_v56, %v1484_v51  ;;  %v1785_v56 = vpop.permute.xlu1 %1784  ;;  %v1780_v51 = vpop.permute.xlu0 %1779 }
 0x24f   :  { %v3231_v39 = vpop.f32.mrf.mxu1 }
 0x250   :  { %v1722_v30 = vadd.f32 %v3231_v39, %v1617_v3  ;;  %v1913_v3 = vand.u32 4294901760, %v1912_v29 }
 0x251   :  { %v1715_v15 = vpop.f32.mrf.mxu1 }
 0x252   :  { %v1762_v11 = vadd.f32 %v1749_v54, %v1722_v30  ;;  %v1716_v10 = vadd.f32 %v1715_v15, %v1611_v60 }
 0x253   :  { %v3234_v37 = vpop.f32.mrf.mxu1 }
 0x254   :  { %v1766_v45 = vmax.f32 %v1762_v11, 0.0  ;;  %v1761_v48 = vadd.f32 %v1744_v59, %v1716_v10  ;;  %v1734_v27 = vadd.f32 %v3234_v37, %v1629_v49  ;;  %v1795_v59 = vpop.permute.xlu1 %1794 }
 0x255   :  { %v1727_v52 = vpop.f32.mrf.mxu1 }
 0x256   :  { %v1765_v4 = vmax.f32 %v1761_v48, 0.0  ;;  %v1764_v6 = vadd.f32 %v1759_v24, %v1734_v27  ;;  %v1728_v23 = vadd.f32 %v1727_v52, %v1623_v43  ;;  %v4391_v22 = vand.u32 4294901760, %v1766_v45 }
 0x258   :  { %v1768_v28 = vmax.f32 %v1764_v6, 0.0  ;;  %v1763_v47 = vadd.f32 %v1754_v32, %v1728_v23  ;;  %v4397_v38 = vand.u32 4294901760, %v1765_v4  ;;  %v1959_v61 = vsub.f32 %v1766_v45, %v4391_v22  ;;  %v1790_v45 = vpop.permute.xlu0 %1789  ;;  %v2440_v29 = vpop.permute.xlu1 %2439 }
 0x25a   :  { %v4402_v20 = vand.u32 4294901760, %v1768_v28  ;;  %v1767_v12 = vmax.f32 %v1763_v47, 0.0  ;;  %v1966_v53 = vsub.f32 %v1765_v4, %v4397_v38  ;;  %v1960_v63 = vand.u32 4294901760, %v1959_v61 }
 0x25c   :  { %v1945_v18 = vsub.f32 %v1768_v28, %v4402_v20  ;;  %v4407_v21 = vand.u32 4294901760, %v1767_v12  ;;  %3235 = vmatprep.subr.mxu0 %v4402_v20  ;;  %v1967_v5 = vand.u32 4294901760, %v1966_v53  ;;  %v1961_v33 = vsub.f32 %v1959_v61, %v1960_v63 }
 0x25d   :  { %3236 = vmatpush3.msra.mxu0 %v4402_v20 }
 0x25e   :  { %v1952_v26 = vsub.f32 %v1767_v12, %v4407_v21  ;;  %3237 = vmatprep.subr.mxu0 %v4407_v21  ;;  %v1946_v46 = vand.u32 4294901760, %v1945_v18  ;;  %v1968_v7 = vsub.f32 %v1966_v53, %v1967_v5  ;;  %v1962_v39 = vand.u32 4294901760, %v1961_v33 }
 0x25f   :  { %3238 = vmatpush3.msra.mxu0 %v4407_v21 }
 0x260   :  { %3239 = vmatprep.subr.mxu0 %v4391_v22  ;;  %v1947_v50 = vsub.f32 %v1945_v18, %v1946_v46  ;;  %v1953_v54 = vand.u32 4294901760, %v1952_v26  ;;  %v1969_v16 = vand.u32 4294901760, %v1968_v7 }
 0x261   :  { %3240 = vmatpush3.msra.mxu0 %v4391_v22 }
 0x262   :  { %3241 = vmatprep.subr.mxu0 %v4397_v38  ;;  %v1948_v19 = vand.u32 4294901760, %v1947_v50  ;;  %v1954_v34 = vsub.f32 %v1952_v26, %v1953_v54 }
 0x263   :  { %3242 = vmatpush3.msra.mxu0 %v4397_v38 }
 0x264   :  { %3244 = vmatmul.mubr.f32.vlgmr.msra.gmra.mxu0 %v1893_v42  ;;  %3249 = vmatprep.subr.mxu1 %v1948_v19  ;;  %v1955_v31 = vand.u32 4294901760, %v1954_v34 }
 0x265   :  { %3263 = vmatprep.subr.mxu0 %v1945_v18  ;;  %3250 = vmatpush3.msra.mxu1 %v1948_v19 }
 0x266   :  { %3264 = vmatpush3.msra.mxu0 %v1945_v18  ;;  %3251 = vmatprep.subr.mxu1 %v1955_v31 }
 0x267   :  { %3265 = vmatprep.subr.mxu0 %v1952_v26  ;;  %3246 = vmatprep.mubr.f32.mxu0 %v1903_v36 }
 0x268   :  { %3252 = vmatpush3.msra.mxu1 %v1955_v31  ;;  %3266 = vmatpush3.msra.mxu0 %v1952_v26 }
 0x269   :  { %3247 = vmatmul.mubr.f32.gmra.mxu0 %v1913_v3  ;;  %3253 = vmatprep.subr.mxu1 %v1962_v39 }
 0x26a   :  { %3267 = vmatprep.subr.mxu0 %v1959_v61  ;;  %3254 = vmatpush3.msra.mxu1 %v1962_v39 }
 0x26b   :  { %3268 = vmatpush3.msra.mxu0 %v1959_v61  ;;  %3255 = vmatprep.subr.mxu1 %v1969_v16 }
 0x26c   :  { %3269 = vmatprep.subr.mxu0 %v1966_v53  ;;  %3256 = vmatpush3.msra.mxu1 %v1969_v16  ;;  %v2450_v16 = vpop.permute.xlu1 %2449 }
 0x26d   :  { %3270 = vmatpush3.msra.mxu0 %v1966_v53  ;;  %3258 = vmatmul.mubr.f32.vlgmr.msra.gmra.mxu1 %v4380_v35 }
 0x26e   :  { %3271 = vmatprep.mubr.f32.mxu0 %v4363_v41  ;;  %3277 = vmatprep.subr.mxu1 %v4402_v20 }
 0x26f   :  { %3291 = vmatprep.subr.mxu0 %v1946_v46  ;;  %3272 = vmatmul.mubr.f32.vlgmr.msra.gmra.mxu0 %v4385_v57 }
 0x270   :  { %3278 = vmatpush3.msra.mxu1 %v4402_v20  ;;  %3292 = vmatpush3.msra.mxu0 %v1946_v46  ;;  %v2435_v46 = vpop.permute.xlu0 %2434 }
 0x271   :  { %3279 = vmatprep.subr.mxu1 %v4407_v21  ;;  %3293 = vmatprep.subr.mxu0 %v1953_v54 }
 0x272   :  { %3260 = vmatprep.mubr.f32.mxu1 %v4387_v62  ;;  %3280 = vmatpush3.msra.mxu1 %v4407_v21 }
 0x273   :  { %3294 = vmatpush3.msra.mxu0 %v1953_v54  ;;  %3261 = vmatmul.mubr.f32.gmra.mxu1 %v4389_v0 }
 0x274   :  { %3281 = vmatprep.subr.mxu1 %v4391_v22  ;;  %3295 = vmatprep.subr.mxu0 %v1960_v63  ;;  %v2445_v3 = vpop.permute.xlu0 %2444 }
 0x275   :  { %3274 = vmatprep.mubr.f32.mxu0 %v4394_v40  ;;  %3282 = vmatpush3.msra.mxu1 %v4391_v22 }
 0x276   :  { %3296 = vmatpush3.msra.mxu0 %v1960_v63  ;;  %3283 = vmatprep.subr.mxu1 %v4397_v38 }
 0x277   :  { %3275 = vmatmul.mubr.f32.gmra.mxu0 %v4400_v13  ;;  %3297 = vmatprep.subr.mxu0 %v1967_v5 }
 0x278   :  { %3284 = vmatpush3.msra.mxu1 %v4397_v38  ;;  %3285 = vmatprep.mubr.f32.mxu1 %v1881_v58 }
 0x279   :  { %3298 = vmatpush3.msra.mxu0 %v1967_v5  ;;  %3286 = vmatmul.mubr.f32.vlgmr.msra.gmra.mxu1 %v1891_v2 }
 0x27a   :  { %3305 = vmatprep.subr.mxu1 %v4402_v20  ;;  %3299 = vmatprep.mubr.f32.mxu0 %v4360_v25 }
 0x27b   :  { %3306 = vmatpush3.msra.mxu1 %v4402_v20  ;;  %3300 = vmatmul.mubr.f32.vlgmr.msra.gmra.mxu0 %v4380_v35 }
 0x27c   :  { %3307 = vmatprep.subr.mxu1 %v4407_v21  ;;  %3288 = vmatprep.mubr.f32.mxu1 %v1901_v9 }
 0x27d   :  { %3308 = vmatpush3.msra.mxu1 %v4407_v21  ;;  %3302 = vmatprep.mubr.f32.mxu0 %v4387_v62 }
 0x27e   :  { %3289 = vmatmul.mubr.f32.gmra.mxu1 %v1911_v1  ;;  %3309 = vmatprep.subr.mxu1 %v4391_v22 }
 0x27f   :  { %3310 = vmatpush3.msra.mxu1 %v4391_v22  ;;  %3303 = vmatmul.mubr.f32.gmra.mxu0 %v4389_v0 }
 0x280   :  { %3311 = vmatprep.subr.mxu1 %v4397_v38  ;;  %3313 = vmatprep.mubr.f32.mxu1 %v4360_v25 }
 0x281   :  { %3312 = vmatpush3.msra.mxu1 %v4397_v38 }
 0x282   :  { %3314 = vmatmul.mubr.f32.vlgmr.msra.gmra.mxu1 %v4380_v35 }
 0x283   :  { %3316 = vmatprep.mubr.f32.mxu1 %v4387_v62 }
 0x286   :  { %3317 = vmatmul.mubr.f32.gmra.mxu1 %v4389_v0 }
 0x324   :  { %v3245_v41 = vpop.f32.mrf.mxu0 }
 0x325   :  { %v1896_v25 = vadd.f32 %v3245_v41, %v1785_v56 }
 0x326   :  { %v1885_v58 = vpop.f32.mrf.mxu0 }
 0x327   :  { %v1886_v11 = vadd.f32 %v1885_v58, %v1780_v51  ;;  %v2469_v51 = vpop.permute.xlu0 %2468 }
 0x329   :  { %v3248_v17 = vpop.f32.mrf.mxu0 }
 0x32a   :  { %v1916_v37 = vadd.f32 %v3248_v17, %v1795_v59  ;;  %v2471_v17 = vlaneseq }
 0x32b   :  { %v1905_v14 = vpop.f32.mrf.mxu0 }
 0x32c   :  { %v1906_v48 = vadd.f32 %v1905_v14, %v1790_v45 }
 0x32d   :  { %v3259_v24 = vpop.f32.mrf.mxu1 }
 0x32e   :  { %v2013_v10 = vadd.f32 %v3259_v24, %v1896_v25 }
 0x32f   :  { %v2006_v60 = vpop.f32.mrf.mxu1  ;;  %v3273_v30 = vpop.f32.mrf.mxu0 }
 0x330   :  { %v2007_v57 = vadd.f32 %v2006_v60, %v1886_v11  ;;  %v2112_v27 = vadd.f32 %v3273_v30, %v2013_v10  ;;  %v2472_v60 = vshrl.u32 %v2471_v17, 7 }
 0x331   :  { %v2104_v8 = vpop.f32.mrf.mxu0 }
 0x332   :  { %v2105_v6 = vadd.f32 %v2104_v8, %v2007_v57 }
 0x333   :  { %v3262_v15 = vpop.f32.mrf.mxu1 }
 0x334   :  { %v2025_v52 = vadd.f32 %v3262_v15, %v1916_v37  ;;  %v2473_v15 = vsub.s32 0, %v2472_v60 }
 0x335   :  { %v2018_v49 = vpop.f32.mrf.mxu1 }
 0x336   :  { %v2019_v23 = vadd.f32 %v2018_v49, %v1906_v48  ;;  %v2474_v49 = vrot.slane %v2469_v51, %v2473_v15 }
 0x337   :  { %v3276_v35 = vpop.f32.mrf.mxu0 }
 0x338   :  { %v2126_v28 = vadd.f32 %v3276_v35, %v2025_v52 }
 0x339   :  { %v2118_v62 = vpop.f32.mrf.mxu0  ;;  %v3287_v43 = vpop.f32.mrf.mxu1 }
 0x33a   :  { %v2211_v32 = vadd.f32 %v3287_v43, %v2112_v27  ;;  %v2119_v13 = vadd.f32 %v2118_v62, %v2019_v23 }
 0x33b   :  { %v2202_v0 = vpop.f32.mrf.mxu1  ;;  %v3301_v4 = vpop.f32.mrf.mxu0 }
 0x33c   :  { %v2203_v47 = vadd.f32 %v2202_v0, %v2105_v6  ;;  %v2316_v20 = vadd.f32 %v3301_v4, %v2211_v32 }
 0x33d   :  { %v2309_v22 = vpop.f32.mrf.mxu0 }
 0x33e   :  { %v3290_v40 = vpop.f32.mrf.mxu1  ;;  %v2310_v9 = vadd.f32 %v2309_v22, %v2203_v47 }
 0x33f   :  { %v3304_v38 = vpop.f32.mrf.mxu0  ;;  %v2227_v12 = vadd.f32 %v3290_v40, %v2126_v28 }
 0x340   :  { %v2218_v2 = vpop.f32.mrf.mxu1 }
 0x341   :  { %v2219_v18 = vadd.f32 %v2218_v2, %v2119_v13  ;;  %v2321_v44 = vpop.f32.mrf.mxu0  ;;  %v2328_v1 = vadd.f32 %v3304_v38, %v2227_v12 }
 0x342   :  { %v3315_v61 = vpop.f32.mrf.mxu1 }
 0x343   :  { %v2409_v21 = vadd.f32 %v3315_v61, %v2316_v20  ;;  %v2322_v63 = vadd.f32 %v2321_v44, %v2219_v18 }
 0x344   :  { %v2402_v53 = vpop.f32.mrf.mxu1 }
 0x345   :  { %v2403_v26 = vadd.f32 %v2402_v53, %v2310_v9  ;;  %v2425_v42 = vmax.f32 %v2409_v21, 0.0 }
 0x346   :  { %v3318_v55 = vpop.f32.mrf.mxu1 }
 0x347   :  { %v2424_v50 = vmax.f32 %v2403_v26, 0.0  ;;  %v2421_v54 = vadd.f32 %v3318_v55, %v2328_v1  ;;  %v2453_v36 = vmul.f32 %v2440_v29, %v2425_v42 }
 0x348   :  { %v2414_v5 = vpop.f32.mrf.mxu1 }
 0x349   :  { %v2452_v19 = vmul.f32 %v2435_v46, %v2424_v50  ;;  %v2415_v34 = vadd.f32 %v2414_v5, %v2322_v63  ;;  %v2427_v33 = vmax.f32 %v2421_v54, 0.0 }
 0x34b   :  { %v2426_v31 = vmax.f32 %v2415_v34, 0.0  ;;  %v2456_v7 = vadd.f32 %v2453_v36, %v2452_v19  ;;  %v2455_v41 = vmul.f32 %v2450_v16, %v2427_v33 }
 0x34d   :  { %v2454_v39 = vmul.f32 %v2445_v3, %v2426_v31 }
 0x34f   :  { %v2457_v58 = vadd.f32 %v2456_v7, %v2454_v39 }
 0x351   :  { %v2458_v14 = vadd.f32 %v2457_v58, %v2455_v41 }
 0x353   :  { %v2459_v24 = vrot.slane %v2458_v14, 4 }
 0x355   :  { %v2460_v30 = vadd.f32 %v2459_v24, %v2458_v14 }
 0x357   :  { %v2461_v56 = vrot.slane %v2460_v30, 2 }
 0x359   :  { %v2462_v8 = vadd.f32 %v2461_v56, %v2460_v30 }
 0x35b   :  { %v2463_v25 = vrot.slane %v2462_v8, 1 }
 0x35d   :  { %v2464_v11 = vadd.f32 %v2463_v25, %v2462_v8 }
 0x35f   :  { %v2475_v10 = vadd.f32 %v2474_v49, %v2464_v11 }
 0x361   :  { %2476 = vst [vmem:[#allocation3] sm:$0x1] %v2475_v10 }
 0x362   :  { %3334 = shalt.err (!%p3331_p4)
}
 0x363   :  { %2486 = dma.vmem_to_hbm [thread:$0]  %s2484_s21, 16, %s4480_s9, [#allocation4]  }
 0x364   :  { %3343 = dma.done.wait [#allocation4], 16  }
 0x365   :  { %3344 = vsyncadd [#allocation4], 4294967280 }
 0x366   :  { %2490 = vsyncpa [#allocation4], 1 }

</bundles_post_ra>
